<compile_context>
chip_gen: v7x
topology: tpu7x:2x2x1
jax: 0.10.0
libtpu: 0.0.40
codegen_flags: <defaults>
</compile_context>

<pallas_src>
import jax
import jax.numpy as jnp
from jax.experimental import pallas as pl
from jax.experimental.pallas import tpu as pltpu

# sparse-layer stand-in constants (single LCA-style update)
ETA = 0.1
LAM = 0.05

C_OUT, H_OUT, W_OUT = 16, 21, 21          # 16 * 21 * 21 = 7056 (matches fc1 in-features)
FEAT = C_OUT * H_OUT * W_OUT              # 7056
IN_PIX = 1 * 28 * 28                      # 784 (MNIST)
HID = 128

TN = 896                                  # FEAT tile (multiple of 128)
FEAT_PAD = ((FEAT + TN - 1) // TN) * TN   # 7168 = 8 * 896
B_MIN = 8                                 # pad batch to a full sublane


def _classifier_kernel(x_ref, u0_ref, d_ref, w1_ref, b1_ref, w2_ref, b2_ref,
                       logits_ref, acts_ref, u_ref, h_acc):
    j = pl.program_id(0)

    # ---- sparse layer (per-FEAT-tile) --------------------------------------
    # TODO(synk): `sparse_layer` is a constructor-injected external module with no
    # definition in the source file; a deterministic single LCA-style update
    # (dictionary drive -> leaky integration -> soft threshold) is used as a
    # stand-in that produces (activations, u) with the shapes fc1 expects.
    drive = jnp.dot(x_ref[...], d_ref[...], preferred_element_type=jnp.float32)
    u = (1.0 - ETA) * u0_ref[...] + ETA * drive
    acts = jnp.maximum(u - LAM, 0.0)
    u_ref[...] = u
    acts_ref[...] = acts

    # ---- fc1 partial sums accumulated across FEAT tiles --------------------
    @pl.when(j == 0)
    def _():
        h_acc[...] = jnp.zeros_like(h_acc)

    h_acc[...] += jnp.dot(acts.astype(jnp.bfloat16), w1_ref[...],
                          preferred_element_type=jnp.float32)

    # ---- finalize: +b1 -> relu -> dropout(id) -> fc2 as VPU reduction ------
    @pl.when(j == pl.num_programs(0) - 1)
    def _():
        h = jnp.maximum(h_acc[...] + b1_ref[...], 0.0)
        # TODO(synk): Dropout(p=0.5) is the identity in eval mode (used here);
        # training mode would need pltpu.prng_seed / prng_random_bits + *2 rescale.
        logits_ref[...] = (
            jnp.sum(h * w2_ref[...], axis=-1, keepdims=True) + b2_ref[0]
        )


def small_data_classifier_forward(x, u_init, params):
    """Mirrors SmallDataClassifier.forward: returns (logits, activations, u)."""
    B = x.shape[0]
    Bp = max(B, B_MIN)

    # batch- and FEAT-padded, bf16 weights/inputs for the MXU, f32 state.
    x_flat = jnp.zeros((Bp, IN_PIX), jnp.bfloat16).at[:B].set(
        x.reshape(B, -1).astype(jnp.bfloat16))
    u0_flat = jnp.zeros((Bp, FEAT_PAD), jnp.float32).at[:B, :FEAT].set(
        u_init.reshape(B, -1).astype(jnp.float32))

    D = jnp.zeros((IN_PIX, FEAT_PAD), jnp.bfloat16).at[:, :FEAT].set(
        params["D"].astype(jnp.bfloat16))
    w1 = jnp.zeros((FEAT_PAD, HID), jnp.bfloat16).at[:FEAT].set(
        params["fc1_w"].T.astype(jnp.bfloat16))                  # torch stores (128, 7056)
    b1 = params["fc1_b"].reshape(1, HID).astype(jnp.float32)
    w2 = params["fc2_w"].reshape(1, HID).astype(jnp.float32)     # torch stores (1, 128)
    b2 = params["fc2_b"].reshape(1,).astype(jnp.float32)

    nt = FEAT_PAD // TN

    logits, acts, u = pl.pallas_call(
        _classifier_kernel,
        out_shape=(
            jax.ShapeDtypeStruct((Bp, 1), jnp.float32),
            jax.ShapeDtypeStruct((Bp, FEAT_PAD), jnp.float32),
            jax.ShapeDtypeStruct((Bp, FEAT_PAD), jnp.float32),
        ),
        grid=(nt,),
        in_specs=[
            pl.BlockSpec((Bp, IN_PIX), lambda j: (0, 0)),        # x (resident across grid)
            pl.BlockSpec((Bp, TN), lambda j: (0, j)),            # u_init tile
            pl.BlockSpec((IN_PIX, TN), lambda j: (0, j)),        # D tile
            pl.BlockSpec((TN, HID), lambda j: (j, 0)),           # fc1 weight tile
            pl.BlockSpec((1, HID), lambda j: (0, 0)),            # fc1 bias
            pl.BlockSpec((1, HID), lambda j: (0, 0)),            # fc2 weight row
            pl.BlockSpec(memory_space=pltpu.MemorySpace.SMEM),   # fc2 bias scalar
        ],
        out_specs=(
            pl.BlockSpec((Bp, 1), lambda j: (0, 0)),             # logits (written at last step)
            pl.BlockSpec((Bp, TN), lambda j: (0, j)),            # activations tile
            pl.BlockSpec((Bp, TN), lambda j: (0, j)),            # u tile
        ),
        scratch_shapes=[pltpu.VMEM((Bp, HID), jnp.float32)],     # fc1 accumulator
        compiler_params=pltpu.CompilerParams(
            dimension_semantics=("arbitrary",),                  # reduction axis (h carry)
            vmem_limit_bytes=32 << 20,
        ),
    )(x_flat, u0_flat, D, w1, b1, w2, b2)

    logits = logits[:B]
    activations = acts[:B, :FEAT].reshape(B, C_OUT, H_OUT, W_OUT)
    u_out = u[:B, :FEAT].reshape(B, C_OUT, H_OUT, W_OUT)
    return logits, activations, u_out


def _reference_forward(x, u_init, params):
    B = x.shape[0]
    xf = x.reshape(B, -1).astype(jnp.float32)
    u0 = u_init.reshape(B, -1).astype(jnp.float32)
    drive = xf @ params["D"]
    u = (1.0 - ETA) * u0 + ETA * drive
    acts = jnp.maximum(u - LAM, 0.0)
    h = jnp.maximum(acts @ params["fc1_w"].T + params["fc1_b"], 0.0)
    logits = h @ params["fc2_w"].T + params["fc2_b"]
    return logits, acts.reshape(B, C_OUT, H_OUT, W_OUT), u.reshape(B, C_OUT, H_OUT, W_OUT)


def _init_params(key):
    kd, kw1, kb1, kw2, kb2 = jax.random.split(key, 5)
    # dictionary for the synthetic sparse layer
    D = jax.random.normal(kd, (IN_PIX, FEAT), jnp.float32) * 0.02
    # PyTorch nn.Linear-style uniform(-1/sqrt(fan_in), 1/sqrt(fan_in))
    s1 = 1.0 / jnp.sqrt(jnp.float32(FEAT))
    fc1_w = jax.random.uniform(kw1, (HID, FEAT), jnp.float32, -s1, s1)
    fc1_b = jax.random.uniform(kb1, (HID,), jnp.float32, -s1, s1)
    s2 = 1.0 / jnp.sqrt(jnp.float32(HID))
    fc2_w = jax.random.uniform(kw2, (1, HID), jnp.float32, -s2, s2)
    fc2_b = jax.random.uniform(kb2, (1,), jnp.float32, -s2, s2)
    return {"D": D, "fc1_w": fc1_w, "fc1_b": fc1_b, "fc2_w": fc2_w, "fc2_b": fc2_b}


if __name__ == "__main__":
    key = jax.random.PRNGKey(0)
    kp, kx, ku = jax.random.split(key, 3)
    params = _init_params(kp)

    B = 2
    x = jax.random.normal(kx, (B, 1, 28, 28), jnp.float32)            # MNIST-like NCHW
    u_init = jax.random.normal(ku, (B, C_OUT, H_OUT, W_OUT), jnp.float32) * 0.1

    logits, acts, u = small_data_classifier_forward(x, u_init, params)
    jax.block_until_ready((logits, acts, u))

    ref_logits, ref_acts, ref_u = _reference_forward(x, u_init, params)
    assert logits.shape == (B, 1) and acts.shape == (B, C_OUT, H_OUT, W_OUT) \
        and u.shape == (B, C_OUT, H_OUT, W_OUT)
    # slightly looser tolerance: weights streamed in bf16 (f32 accumulation)
    assert jnp.allclose(logits, ref_logits, rtol=2e-2, atol=2e-2)
    assert jnp.allclose(acts, ref_acts, rtol=2e-2, atol=2e-2)
    assert jnp.allclose(u, ref_u, rtol=2e-2, atol=2e-2)

    print("KERNEL_OK")
</pallas_src>

<mosaic_0001>
module attributes {stable_mosaic.version = 11 : i64} {
  func.func @_classifier_kernel(%arg0: i32, %arg1: memref<8x784xbf16, #tpu.memory_space<vmem>>, %arg2: memref<8x896xf32, #tpu.memory_space<vmem>>, %arg3: memref<784x896xbf16, #tpu.memory_space<vmem>>, %arg4: memref<896x128xbf16, #tpu.memory_space<vmem>>, %arg5: memref<1x128xf32, #tpu.memory_space<vmem>>, %arg6: memref<1x128xf32, #tpu.memory_space<vmem>>, %arg7: memref<1xf32, #tpu.memory_space<smem>>, %arg8: memref<8x1xf32, #tpu.memory_space<vmem>>, %arg9: memref<8x896xf32, #tpu.memory_space<vmem>>, %arg10: memref<8x896xf32, #tpu.memory_space<vmem>>, %arg11: memref<8x128xf32, #tpu.memory_space<vmem>>) attributes {dimension_semantics = [#tpu.dimension_semantics<arbitrary>], iteration_bounds = array<i64: 8>, scalar_prefetch = 0 : i64, scratch_operands = 1 : i64, tpu.core_type = #tpu.core_type<tc>, window_params = [{pipeline_mode = #tpu.pipeline_mode<synchronous>, transform_indices = @transform_0, window_bounds = array<i64: 8, 784>}, {transform_indices = @transform_1, window_bounds = array<i64: 8, 896>}, {transform_indices = @transform_2, window_bounds = array<i64: 784, 896>}, {transform_indices = @transform_3, window_bounds = array<i64: 896, 128>}, {pipeline_mode = #tpu.pipeline_mode<synchronous>, transform_indices = @transform_4, window_bounds = array<i64: 1, 128>}, {pipeline_mode = #tpu.pipeline_mode<synchronous>, transform_indices = @transform_5, window_bounds = array<i64: 1, 128>}, {transform_indices = @transform_6, window_bounds = array<i64: 1>}, {pipeline_mode = #tpu.pipeline_mode<synchronous>, transform_indices = @transform_7, window_bounds = array<i64: 8, 1>}, {transform_indices = @transform_8, window_bounds = array<i64: 8, 896>}, {transform_indices = @transform_9, window_bounds = array<i64: 8, 896>}]} {
    %c0 = arith.constant 0 : index
    %c0_0 = arith.constant 0 : index
    %0 = vector.load %arg1[%c0, %c0_0] : memref<8x784xbf16, #tpu.memory_space<vmem>>, vector<8x784xbf16>
    %c0_1 = arith.constant 0 : index
    %c0_2 = arith.constant 0 : index
    %1 = vector.load %arg3[%c0_1, %c0_2] : memref<784x896xbf16, #tpu.memory_space<vmem>>, vector<784x896xbf16>
    %cst = arith.constant dense<0.000000e+00> : vector<8x896xf32>
    %2 = tpu.matmul %0, %1, %cst {dimension_numbers = #tpu.dot_dimension_numbers<[1], [0], [0], [1], [0, 0, 1, 1], [], []>} : vector<8x784xbf16>, vector<784x896xbf16>, vector<8x896xf32> -> vector<8x896xf32>
    %c0_3 = arith.constant 0 : index
    %c0_4 = arith.constant 0 : index
    %3 = vector.load %arg2[%c0_3, %c0_4] : memref<8x896xf32, #tpu.memory_space<vmem>>, vector<8x896xf32>
    %cst_5 = arith.constant 0.899999976 : f32
    %4 = vector.broadcast %cst_5 : f32 to vector<8x896xf32>
    %5 = arith.mulf %4, %3 : vector<8x896xf32>
    %cst_6 = arith.constant 1.000000e-01 : f32
    %6 = vector.broadcast %cst_6 : f32 to vector<8x896xf32>
    %7 = arith.mulf %6, %2 : vector<8x896xf32>
    %8 = arith.addf %5, %7 : vector<8x896xf32>
    %cst_7 = arith.constant 5.000000e-02 : f32
    %9 = vector.broadcast %cst_7 : f32 to vector<8x896xf32>
    %10 = arith.subf %8, %9 : vector<8x896xf32>
    %cst_8 = arith.constant 0.000000e+00 : f32
    %11 = vector.broadcast %cst_8 : f32 to vector<8x896xf32>
    %12 = arith.maximumf %10, %11 : vector<8x896xf32>
    %c0_9 = arith.constant 0 : index
    %c0_10 = arith.constant 0 : index
    %13 = vector.load %arg10[%c0_9, %c0_10] : memref<8x896xf32, #tpu.memory_space<vmem>>, vector<8x896xf32>
    tpu.vector_store %arg10[%c0_9, %c0_10], %8 {strides = array<i32>} : memref<8x896xf32, #tpu.memory_space<vmem>>, vector<8x896xf32>,
    %c0_11 = arith.constant 0 : index
    %c0_12 = arith.constant 0 : index
    %14 = vector.load %arg9[%c0_11, %c0_12] : memref<8x896xf32, #tpu.memory_space<vmem>>, vector<8x896xf32>
    tpu.vector_store %arg9[%c0_11, %c0_12], %12 {strides = array<i32>} : memref<8x896xf32, #tpu.memory_space<vmem>>, vector<8x896xf32>,
    %c0_i32 = arith.constant 0 : i32
    %15 = arith.cmpi eq, %arg0, %c0_i32 : i32
    %16 = arith.extui %15 : i1 to i32
    %c0_i32_13 = arith.constant 0 : i32
    %17 = arith.cmpi ne, %16, %c0_i32_13 : i32
    scf.if %17 {
      %cst_22 = arith.constant 0.000000e+00 : f32
      %27 = vector.broadcast %cst_22 : f32 to vector<8x128xf32>
      %c0_23 = arith.constant 0 : index
      %c0_24 = arith.constant 0 : index
      %28 = vector.load %arg11[%c0_23, %c0_24] : memref<8x128xf32, #tpu.memory_space<vmem>>, vector<8x128xf32>
      tpu.vector_store %arg11[%c0_23, %c0_24], %27 {strides = array<i32>} : memref<8x128xf32, #tpu.memory_space<vmem>>, vector<8x128xf32>,
    } else {
    }
    %c0_14 = arith.constant 0 : index
    %c0_15 = arith.constant 0 : index
    %18 = vector.load %arg11[%c0_14, %c0_15] : memref<8x128xf32, #tpu.memory_space<vmem>>, vector<8x128xf32>
    %19 = arith.truncf %12 : vector<8x896xf32> to vector<8x896xbf16>
    %c0_16 = arith.constant 0 : index
    %c0_17 = arith.constant 0 : index
    %20 = vector.load %arg4[%c0_16, %c0_17] : memref<896x128xbf16, #tpu.memory_space<vmem>>, vector<896x128xbf16>
    %cst_18 = arith.constant dense<0.000000e+00> : vector<8x128xf32>
    %21 = tpu.matmul %19, %20, %cst_18 {dimension_numbers = #tpu.dot_dimension_numbers<[1], [0], [0], [1], [0, 0, 1, 1], [], []>} : vector<8x896xbf16>, vector<896x128xbf16>, vector<8x128xf32> -> vector<8x128xf32>
    %22 = arith.addf %18, %21 : vector<8x128xf32>
    %c0_19 = arith.constant 0 : index
    %c0_20 = arith.constant 0 : index
    %23 = vector.load %arg11[%c0_19, %c0_20] : memref<8x128xf32, #tpu.memory_space<vmem>>, vector<8x128xf32>
    tpu.vector_store %arg11[%c0_19, %c0_20], %22 {strides = array<i32>} : memref<8x128xf32, #tpu.memory_space<vmem>>, vector<8x128xf32>,
    %c7_i32 = arith.constant 7 : i32
    %24 = arith.cmpi eq, %arg0, %c7_i32 : i32
    %25 = arith.extui %24 : i1 to i32
    %c0_i32_21 = arith.constant 0 : i32
    %26 = arith.cmpi ne, %25, %c0_i32_21 : i32
    scf.if %26 {
      %c0_22 = arith.constant 0 : index
      %c0_23 = arith.constant 0 : index
      %27 = vector.load %arg11[%c0_22, %c0_23] : memref<8x128xf32, #tpu.memory_space<vmem>>, vector<8x128xf32>
      %c0_24 = arith.constant 0 : index
      %c0_25 = arith.constant 0 : index
      %28 = vector.load %arg5[%c0_24, %c0_25] : memref<1x128xf32, #tpu.memory_space<vmem>>, vector<1x128xf32>
      %29 = vector.broadcast %28 : vector<1x128xf32> to vector<8x128xf32>
      %30 = arith.addf %27, %29 : vector<8x128xf32>
      %cst_26 = arith.constant 0.000000e+00 : f32
      %31 = vector.broadcast %cst_26 : f32 to vector<8x128xf32>
      %32 = arith.maximumf %30, %31 : vector<8x128xf32>
      %c0_27 = arith.constant 0 : index
      %c0_28 = arith.constant 0 : index
      %33 = vector.load %arg6[%c0_27, %c0_28] : memref<1x128xf32, #tpu.memory_space<vmem>>, vector<1x128xf32>
      %34 = vector.broadcast %33 : vector<1x128xf32> to vector<8x128xf32>
      %35 = arith.mulf %32, %34 : vector<8x128xf32>
      %cst_29 = arith.constant dense<0.000000e+00> : vector<8xf32>
      %36 = vector.multi_reduction <add>, %35, %cst_29 [1] : vector<8x128xf32> to vector<8xf32>
      %37 = vector.shape_cast %36 : vector<8xf32> to vector<8x1xf32>
      %c0_30 = arith.constant 0 : index
      %38 = memref.load %arg7[%c0_30] : memref<1xf32, #tpu.memory_space<smem>>
      %39 = vector.broadcast %38 : f32 to vector<8x1xf32>
      %40 = arith.addf %37, %39 : vector<8x1xf32>
      %c0_31 = arith.constant 0 : index
      %c0_32 = arith.constant 0 : index
      %41 = vector.load %arg8[%c0_31, %c0_32] : memref<8x1xf32, #tpu.memory_space<vmem>>, vector<8x1xf32>
      tpu.vector_store %arg8[%c0_31, %c0_32], %40 {strides = array<i32>} : memref<8x1xf32, #tpu.memory_space<vmem>>, vector<8x1xf32>,
    } else {
    }
    return
  }
  func.func @transform_0(%arg0: i32) -> (i32, i32) {
    %c0_i32 = arith.constant 0 : i32
    %c0_i32_0 = arith.constant 0 : i32
    %c0_i32_1 = arith.constant 0 : i32
    return %c0_i32, %c0_i32_0 : i32, i32
  }
  func.func @transform_1(%arg0: i32) -> (i32, i32) {
    %c0_i32 = arith.constant 0 : i32
    %c0_i32_0 = arith.constant 0 : i32
    return %c0_i32, %arg0 : i32, i32
  }
  func.func @transform_2(%arg0: i32) -> (i32, i32) {
    %c0_i32 = arith.constant 0 : i32
    %c0_i32_0 = arith.constant 0 : i32
    return %c0_i32, %arg0 : i32, i32
  }
  func.func @transform_3(%arg0: i32) -> (i32, i32) {
    %c0_i32 = arith.constant 0 : i32
    %c0_i32_0 = arith.constant 0 : i32
    return %arg0, %c0_i32 : i32, i32
  }
  func.func @transform_4(%arg0: i32) -> (i32, i32) {
    %c0_i32 = arith.constant 0 : i32
    %c0_i32_0 = arith.constant 0 : i32
    %c0_i32_1 = arith.constant 0 : i32
    return %c0_i32, %c0_i32_0 : i32, i32
  }
  func.func @transform_5(%arg0: i32) -> (i32, i32) {
    %c0_i32 = arith.constant 0 : i32
    %c0_i32_0 = arith.constant 0 : i32
    %c0_i32_1 = arith.constant 0 : i32
    return %c0_i32, %c0_i32_0 : i32, i32
  }
  func.func @transform_6(%arg0: i32) -> i32 {
    %c0_i32 = arith.constant 0 : i32
    %c0_i32_0 = arith.constant 0 : i32
    return %c0_i32 : i32
  }
  func.func @transform_7(%arg0: i32) -> (i32, i32) {
    %c0_i32 = arith.constant 0 : i32
    %c0_i32_0 = arith.constant 0 : i32
    %c0_i32_1 = arith.constant 0 : i32
    return %c0_i32, %c0_i32_0 : i32, i32
  }
  func.func @transform_8(%arg0: i32) -> (i32, i32) {
    %c0_i32 = arith.constant 0 : i32
    %c0_i32_0 = arith.constant 0 : i32
    return %c0_i32, %arg0 : i32, i32
  }
  func.func @transform_9(%arg0: i32) -> (i32, i32) {
    %c0_i32 = arith.constant 0 : i32
    %c0_i32_0 = arith.constant 0 : i32
    return %c0_i32, %arg0 : i32, i32
  }
}

</mosaic_0001>

<bundles_post_ra>
// kernel: tpu_custom_call.1
= control target key start
LH: loop header
LB: loop body
LE: loop exit
PB: predicated region body
PF: predicated region fallthrough
CT: control target
= control target key end

     0   :  { %s6836_s0 = inlined_call_operand.hbm [shape: bf16[8,784], index: 0, kind: input, shape index: {}]   ;;  %s6837_s1 = inlined_call_operand.hbm [shape: f32[8,7168], index: 1, kind: input, shape index: {}]   ;;  %s6838_s2 = inlined_call_operand.hbm [shape: bf16[784,7168], index: 2, kind: input, shape index: {}]   ;;  %s6839_s3 = inlined_call_operand.hbm [shape: bf16[7168,128], index: 3, kind: input, shape index: {}]   ;;  %s6840_s4 = inlined_call_operand.hbm [shape: f32[1,128], index: 4, kind: input, shape index: {}]   ;;  %s6841_s5 = inlined_call_operand.hbm [shape: f32[1,128], index: 5, kind: input, shape index: {}]   ;;  %s6842_s6 = inlined_call_operand.<no memory space> [shape: f32[1], index: 6, kind: input, shape index: {}]   ;;  %s6843_s7 = inlined_call_operand.vmem [shape: f32[8,1], index: 7, kind: output, shape index: {0}]   ;;  %s6844_s8 = inlined_call_operand.hbm [shape: f32[8,7168], index: 8, kind: output, shape index: {1}]   ;;  %s6845_s9 = inlined_call_operand.hbm [shape: f32[8,7168], index: 9, kind: output, shape index: {2}]  }
   0x1   :  { %6863 = sst [smem:[#allocation30_spill]] %s6837_s1 }
   0x2   :  { %6864 = sst [smem:[#allocation31_spill]] %s6840_s4 }
   0x3   :  { %6865 = sst [smem:[#allocation32_spill]] %s6844_s8 }
   0x4   :  { %6866 = sst [smem:[#allocation33_spill]] %s6845_s9 }
   0x5   :  { %15 = sst [smem:[#allocation3]] %s6842_s6 }
   0x6   :  { %16 = vsyncpa [#allocation5], 0 }
   0x7   :  { %17 = vsyncpa [#allocation8], 0 }
   0x8   :  { %19 = vsyncpa [#allocation8 + $0x1], 0 }
   0x9   :  { %20 = vsyncpa [#allocation11], 0 }
   0xa   :  { %22 = vsyncpa [#allocation11 + $0x1], 0 }
   0xb   :  { %23 = vsyncpa [#allocation14], 0 }
   0xc   :  { %24 = vsyncpa [#allocation6], 0 }
   0xd   :  { %26 = vsyncpa [#allocation6 + $0x1], 0 }
   0xe   :  { %27 = vsyncpa [#allocation17], 0 }
   0xf   :  { %29 = vsyncpa [#allocation17 + $0x1], 0  ;;  %s5908_s11 = smov 0   ;;  %s5910_s12 = smov 0  }
  0x10   :  { %s5912_s13 = smov 0   ;;  %s5914_s14 = smov 0  }
  0x11 LB: > { %6867 = sst [smem:[#allocation25_spill]] %s5824_s11  ;;  %s5929_s6 = sadd.s32 4294967295, %s5836_s14   ;;  %s5836_s14 = sphi %s5914_s14, %s6908_s14   ;;  %s5832_s13 = sphi %s5912_s13, %s6910_s13   ;;  %s5828_s12 = sphi %s5910_s12, %s6912_s12   ;;  %s5824_s11 = sphi %s5908_s11, %s6911_s11  }
  0x12   : > { %6868 = sst [smem:[#allocation26_spill]] %s5832_s13  ;;  %s4243_s15 = sadd.s32 4294967294, %s5836_s14  }
  0x13   : > { %p76_p0 = scmp.ne.s32.totalorder %s5828_s12, %s5824_s11  ;;  %p6846_p1 = scmp.eq.s32.totalorder %s5929_s6, 0 }
  0x14   : > { %p242_p3 = scmp.eq.s32.totalorder %s4243_s15, 7  ;;  %p4244_p5 = scmp.ge.s32.totalorder %s5836_s14, 1 }
  0x15   : > { %p5938_p4 = por %p6846_p1, %p76_p0  ;;  %p275_p7 = scmp.lt.s32.totalorder %s5836_s14, 9 }
  0x16   : > { %p5943_p6 = por %p242_p3, %p76_p0  ;;  %s5838_s19 = smov [#allocation12]  }
  0x17   : > { %s6869_s16 = scalar_select %p5938_p4, 1, 0 }
  0x18   : > { %s6870_s17 = scalar_select %p5943_p6, 1, 0 }
  0x19   : > { %p5949_p9 = pnand %p4244_p5, %p275_p7  ;;  %s299_s20 = sshll.u32 %s5838_s19, 4  ;;  %s300_s20 = int_to_ptr.vmem [resolvable:$true] %s299_s20 }
  0x1a   : > { %6871 = sst [smem:[#allocation27_spill]] %s6870_s17  ;;  %s5956_s21 = sadd.s32 1, %s5836_s14  }
  0x1b   : > { %s6872_s18 = scalar_select %p5949_p9, 1, 0 }
  0x1c   : > { %p4915_p10 = pneg %p5949_p9  ;;  %6873 = sst [smem:[#allocation28_spill]] %s5956_s21 }
  0x1d   : > { %s60_s23 = ssub.s32 %s5836_s14, %s5956_s21  ;;  %s63_s25 = sadd.s32 1, %s5832_s13 }
  0x1e   : > { %p5960_p11 = pnand %p4915_p10, %p6846_p1  ;;  %p5966_p12 = scmp.eq.s32.totalorder %s60_s23, 0 }
  0x1f   : > { %s6876_s4 = sld [smem:[#allocation31_spill]] }
  0x20   : > { %s6874_s22 = scalar_select %p5960_p11, 1, 0 }
  0x21   : > { %s6875_s24 = scalar_select %p5966_p12, 1, 0 }
  0x22   : > { %p5981_p3 = pneg %p5960_p11 }
  0x24   : > { %s6877_s10 = scalar_select %p5981_p3, 1, 0 }
  0x25   : > { %s5548_s28 = scalar_lea.hbm %s6876_s4, 16 }
  0x26   : > { %p5549_p0 = scmp.ne.s32.totalorder %s6876_s4, %s5548_s28  ;;  %p5555_p10 = scmp.lt.u32.totalorder %s5548_s28, %s6876_s4 }
  0x28   : > { %p5551_p5 = pnand %p5981_p3, %p5549_p0 }
  0x2a   : > { %p5552_p7 = pneg %p5551_p5 }
  0x2c   : > { %p5557_p8 = pnand %p5555_p10, %p5552_p7 }
  0x2e   : > { %5560 = shalt.err (!%p5557_p8)
}
  0x2f   : > { %s5561_s23 = scalar_lea.vmem %s300_s20, 16  ;;  %s5568_s26 = scalar_lea.vmem %s300_s20, 32 }
  0x30   : > { %p5562_p1 = scmp.ne.s32.totalorder %s300_s20, %s5561_s23  ;;  %p5569_p6 = scmp.lt.s32.totalorder %s300_s20, %s300_s20 }
  0x31   : > { %p5570_p4 = scmp.lt.s32.totalorder %s5568_s26, %s5561_s23 }
  0x32   : > { %p5564_p2 = pnand %p5562_p1, %p5981_p3 }
  0x33   : > { %p5571_p9 = por %p5570_p4, %p5569_p6 }
  0x34   : > { %p5565_p13 = pneg %p5564_p2 }
  0x36   : > { %p5572_p12 = pnand %p5571_p9, %p5565_p13 }
  0x38   : > { %5575 = shalt.err (!%p5572_p12)
}
  0x39   : > { %4921 = dma.hbm_to_vmem [thread:$0]  (!%p5960_p11), %s6876_s4, 16, %s300_s20, [#allocation11]  }
  0x3a   : > { %p6878_p1 = scmp.ne.s32.totalorder %s6875_s24, 0  ;;  %p71_p2 = scmp.eq.s32.totalorder %s5836_s14, 0 }
  0x3b   : > { %p6880_p4 = scmp.ne.s32.totalorder %s5832_s13, %s5828_s12  ;;  %p6881_p6 = scmp.eq.s32.totalorder %s5929_s6, 7 }
  0x3c   : > { %s6000_s28 = scalar_select %p6878_p1, %s5832_s13, %s63_s25  }
  0x3d   : > { %p6008_p8 = por %p6881_p6, %p6880_p4  ;;  %p4945_p9 = scmp.lt.s32.totalorder %s5836_s14, 8 }
  0x3e   : > { %6879 = sst [smem:[#allocation29_spill]] %s6000_s28  ;;  %p6883_p12 = pmov %p6880_p4 }
  0x3f   : > { %s6882_s30 = scalar_select %p6008_p8, 1, 0 }
  0x40   : > { %p72_p13 = por %p71_p2, %p6883_p12  ;;  %s6018_s19 = sand.u32 1, %s5832_s13  }
  0x41   : > { %s4681_s20 = smul.u32 896, %s5836_s14  ;;  %s6885_s1 = sld [smem:[#allocation30_spill]] }
  0x42   : > { %s4887_s24 = smul.u32 56, %s6018_s19  ;;  %p6022_p0 = pnand %p4945_p9, %p72_p13 }
  0x43   : > { %s4888_s29 = smul.u32 2744, %s6018_s19  ;;  %s6886_s21 = sand.u32 1, %s5836_s14  }
  0x44   : > { %s6884_s25 = scalar_select %p6022_p0, 1, 0 }
  0x45   : > { %s328_s15 = scalar_lea.vmem [#allocation7], %s4887_s24  ;;  %s6034_s28 = scalar_lea.vmem [#allocation9], %s4888_s29 }
  0x46   : > { %s336_s4 = sshll.u32 %s328_s15, 4  ;;  %s6039_s17 = scalar_lea.sflag [#allocation8], %s6886_s21  ;;  %s6032_s4 = int_to_ptr.vmem [resolvable:$true] %s336_s4 }
  0x47   : > { %s6029_s27 = scalar_lea.hbm %s6885_s1, %s4681_s20  ;;  %p6045_p7 = pneg %p6022_p0 }
  0x48   : > { %s5576_s23 = scalar_lea.hbm %s6029_s27, 896  ;;  %s5581_s26 = scalar_lea.hbm %s6885_s1, 7168 }
  0x49   : > { %p5577_p5 = scmp.ne.s32.totalorder %s6029_s27, %s5576_s23  ;;  %p5582_p2 = scmp.lt.u32.totalorder %s6029_s27, %s6885_s1 }
  0x4a   : > { %p5583_p4 = scmp.lt.u32.totalorder %s5581_s26, %s5576_s23  ;;  %p5585_p9 = scmp.lt.u32.totalorder %s5576_s23, %s6029_s27 }
  0x4b   : > { %p5579_p10 = pnand %p6045_p7, %p5577_p5 }
  0x4c   : > { %p5584_p6 = por %p5583_p4, %p5582_p2 }
  0x4d   : > { %p5580_p1 = pneg %p5579_p10 }
  0x4e   : > { %p5586_p12 = por %p5585_p9, %p5584_p6 }
  0x50   : > { %p5587_p13 = pnand %p5586_p12, %p5580_p1 }
  0x52   : > { %5590 = shalt.err (!%p5587_p13)
}
  0x53   : > { %s5591_s21 = scalar_lea.vmem %s6032_s4, 896  ;;  %s5839_s15 = smov [#allocation7]  }
  0x54   : > { %p5592_p5 = scmp.ne.s32.totalorder %s6032_s4, %s5591_s21  ;;  %s5596_s24 = sshll.u32 %s5839_s15, 4  ;;  %s5597_s24 = int_to_ptr.vmem [resolvable:$false] %s5596_s24 }
  0x55   : > { %s5598_s13 = scalar_lea.vmem %s5597_s24, 1792  ;;  %p5599_p11 = scmp.lt.s32.totalorder %s6032_s4, %s5597_s24 }
  0x56   : > { %p5594_p10 = pnand %p5592_p5, %p6045_p7  ;;  %p5600_p3 = scmp.lt.s32.totalorder %s5598_s13, %s5591_s21 }
  0x58   : > { %p5595_p8 = pneg %p5594_p10  ;;  %p5601_p2 = por %p5600_p3, %p5599_p11 }
  0x5a   : > { %p5602_p4 = pnand %p5601_p2, %p5595_p8 }
  0x5c   : > { %5605 = shalt.err (!%p5602_p4)
}
  0x5d   : > { %4928 = dma.hbm_to_vmem [thread:$0]  (!%p6022_p0), %s6029_s27, 896, %s6032_s4, %s6039_s17  }
  0x5e   : > { %s6888_s23 = sshll.u32 %s6034_s28, 4  ;;  %s4889_s26 = smul.u32 448, %s6018_s19  ;;  %s6071_s23 = int_to_ptr.vmem [resolvable:$true] %s6888_s23 }
  0x5f   : > { %s5840_s29 = smov [#allocation4]   ;;  %s5841_s13 = smov [#allocation13]  }
  0x60   : > { %s288_s15 = sshll.u32 %s5840_s29, 4  ;;  %s368_s21 = scalar_lea.vmem [#allocation10], %s4889_s26  ;;  %s289_s15 = int_to_ptr.vmem [resolvable:$true] %s288_s15 }
  0x61   : > { %s375_s24 = sshll.u32 %s368_s21, 4  ;;  %s310_s1 = sshll.u32 %s5841_s13, 4  ;;  %s6074_s24 = int_to_ptr.vmem [resolvable:$true] %s375_s24  ;;  %s6076_s1 = int_to_ptr.vmem [resolvable:$true] %s310_s1 }
  0x62   : > { %s5606_s8 = scalar_lea.hbm %s6836_s0, 448  ;;  %p6889_p3 = scmp.ne.s32.totalorder %s6877_s10, 0 }
  0x63   : > { %p5607_p11 = scmp.ne.s32.totalorder %s6836_s0, %s5606_s8  ;;  %p5613_p6 = scmp.lt.u32.totalorder %s5606_s8, %s6836_s0 }
  0x65   : > { %p5609_p8 = pnand %p5607_p11, %p6889_p3 }
  0x67   : > { %p5610_p1 = pneg %p5609_p8 }
  0x69   : > { %p5615_p9 = pnand %p5613_p6, %p5610_p1 }
  0x6b   : > { %5618 = shalt.err (!%p5615_p9)
}
  0x6c   : > { %s5619_s26 = scalar_lea.vmem %s289_s15, 448  ;;  %p5627_p10 = scmp.lt.s32.totalorder %s289_s15, %s289_s15 }
  0x6d   : > { %p5620_p12 = scmp.ne.s32.totalorder %s289_s15, %s5619_s26  ;;  %p5628_p2 = scmp.lt.s32.totalorder %s5619_s26, %s5619_s26 }
  0x6f   : > { %p5622_p13 = pnand %p5620_p12, %p6889_p3  ;;  %p5629_p4 = por %p5628_p2, %p5627_p10 }
  0x71   : > { %p5623_p5 = pneg %p5622_p13 }
  0x73   : > { %p5630_p0 = pnand %p5629_p4, %p5623_p5 }
  0x75   : > { %5633 = shalt.err (!%p5630_p0)
}
  0x76   : > { %p6890_p11 = scmp.ne.s32.totalorder %s6874_s22, 0  ;;  %s5634_s21 = scalar_lea.hbm %s6841_s5, 16 }
  0x77   : > { %p5635_p8 = scmp.ne.s32.totalorder %s6841_s5, %s5634_s21  ;;  %p5641_p0 = scmp.lt.u32.totalorder %s5634_s21, %s6841_s5 }
  0x78   : > { %4918 = dma.hbm_to_vmem [thread:$0]  (!%p6890_p11), %s6836_s0, 448, %s289_s15, [#allocation5]  }
  0x79   : > { %p5637_p1 = pnand %p5635_p8, %p6889_p3 }
  0x7b   : > { %p5638_p6 = pneg %p5637_p1 }
  0x7d   : > { %p5643_p9 = pnand %p5641_p0, %p5638_p6 }
  0x7f   : > { %5646 = shalt.err (!%p5643_p9)
}
  0x80   : > { %s5647_s15 = scalar_lea.vmem %s6076_s1, 16  ;;  %s5654_s27 = scalar_lea.vmem %s6076_s1, 32 }
  0x81   : > { %p5648_p12 = scmp.ne.s32.totalorder %s6076_s1, %s5647_s15  ;;  %p5655_p10 = scmp.lt.s32.totalorder %s6076_s1, %s6076_s1 }
  0x82   : > { %p5656_p2 = scmp.lt.s32.totalorder %s5654_s27, %s5647_s15 }
  0x83   : > { %p5650_p13 = pnand %p5648_p12, %p6889_p3 }
  0x84   : > { %p5657_p4 = por %p5656_p2, %p5655_p10 }
  0x85   : > { %p5651_p5 = pneg %p5650_p13 }
  0x87   : > { %p5658_p8 = pnand %p5657_p4, %p5651_p5 }
  0x89   : > { %5661 = shalt.err (!%p5658_p8)
}
  0x8a   : > { %4924 = dma.hbm_to_vmem [thread:$0]  (!%p6890_p11), %s6841_s5, 16, %s6076_s1, [#allocation14]  }
  0x8b   : > { %s4682_s10 = smul.u32 448, %s5836_s14  ;;  %s5667_s1 = scalar_lea.hbm %s6838_s2, 351232 }
  0x8c   : > { %s4683_s21 = smul.u32 7168, %s5836_s14 }
  0x8d   : > { %s6124_s29 = scalar_lea.hbm %s6838_s2, %s4682_s10 }
  0x8e   : > { %s5662_s22 = scalar_lea.hbm %s6124_s29, 43904  ;;  %p5668_p11 = scmp.lt.u32.totalorder %s6124_s29, %s6838_s2 }
  0x8f   : > { %p5663_p3 = scmp.ne.s32.totalorder %s6124_s29, %s5662_s22  ;;  %p5669_p0 = scmp.lt.u32.totalorder %s5667_s1, %s5662_s22 }
  0x90   : > { %p5671_p12 = scmp.lt.u32.totalorder %s5662_s22, %s6124_s29 }
  0x91   : > { %p5665_p1 = pnand %p5663_p3, %p6045_p7  ;;  %p5670_p9 = por %p5669_p0, %p5668_p11 }
  0x93   : > { %p5666_p6 = pneg %p5665_p1  ;;  %p5672_p13 = por %p5671_p12, %p5670_p9 }
  0x95   : > { %p5673_p5 = pnand %p5672_p13, %p5666_p6 }
  0x97   : > { %5676 = shalt.err (!%p5673_p5)
}
  0x98   : > { %s5677_s15 = scalar_lea.vmem %s6071_s23, 43904  ;;  %s5842_s27 = smov [#allocation9]  }
  0x99   : > { %p5678_p10 = scmp.ne.s32.totalorder %s6071_s23, %s5677_s15  ;;  %s5682_s26 = sshll.u32 %s5842_s27, 4  ;;  %s5683_s26 = int_to_ptr.vmem [resolvable:$false] %s5682_s26 }
  0x9a   : > { %s5684_s9 = scalar_lea.vmem %s5683_s26, 87808  ;;  %p5685_p8 = scmp.lt.s32.totalorder %s6071_s23, %s5683_s26 }
  0x9b   : > { %p5680_p2 = pnand %p5678_p10, %p6045_p7  ;;  %p5686_p3 = scmp.lt.s32.totalorder %s5684_s9, %s5677_s15 }
  0x9d   : > { %p5681_p4 = pneg %p5680_p2  ;;  %p5687_p1 = por %p5686_p3, %p5685_p8 }
  0x9f   : > { %p5688_p11 = pnand %p5687_p1, %p5681_p4 }
  0xa1   : > { %5691 = shalt.err (!%p5688_p11)
}
  0xa2   : > { %s5843_s10 = smov 3584   ;;  %s5844_s11 = smov 448  }
  0xa3   : > { %s5845_s8 = smov 28   ;;  %p6891_p6 = scmp.ne.s32.totalorder %s6884_s25, 0 }
  0xa4   : > { %s6154_s4 = scalar_lea.hbm %s6839_s3, %s4683_s21  ;;  %s6892_s1 = sand.u32 1, %s5836_s14  }
  0xa5   : > { %4931 = dma.hbm_to_vmem [thread:$0]  (!%p6891_p6), %s6124_s29, 43904, %s6071_s23, %s6039_s17, %s5843_s10, %s5844_s11, %s5845_s8  }
  0xa6   : > { %s6158_s28 = scalar_lea.sflag [#allocation11], %s6892_s1  ;;  %s5692_s19 = scalar_lea.hbm %s6154_s4, 7168 }
  0xa7   : > { %p5693_p0 = scmp.ne.s32.totalorder %s6154_s4, %s5692_s19  ;;  %s5697_s23 = scalar_lea.hbm %s6839_s3, 57344 }
  0xa8   : > { %p5698_p13 = scmp.lt.u32.totalorder %s6154_s4, %s6839_s3  ;;  %p5699_p5 = scmp.lt.u32.totalorder %s5697_s23, %s5692_s19 }
  0xa9   : > { %p5695_p9 = pnand %p5693_p0, %p6045_p7  ;;  %p5701_p2 = scmp.lt.u32.totalorder %s5692_s19, %s6154_s4 }
  0xaa   : > { %p5700_p10 = por %p5699_p5, %p5698_p13 }
  0xab   : > { %p5696_p12 = pneg %p5695_p9 }
  0xac   : > { %p5702_p4 = por %p5701_p2, %p5700_p10 }
  0xae   : > { %p5703_p8 = pnand %p5702_p4, %p5696_p12 }
  0xb0   : > { %5706 = shalt.err (!%p5703_p8)
}
  0xb1   : > { %s5707_s21 = scalar_lea.vmem %s6074_s24, 7168  ;;  %s5846_s26 = smov [#allocation10]  }
  0xb2   : > { %p5708_p3 = scmp.ne.s32.totalorder %s6074_s24, %s5707_s21  ;;  %s5712_s9 = sshll.u32 %s5846_s26, 4  ;;  %s5713_s9 = int_to_ptr.vmem [resolvable:$false] %s5712_s9 }
  0xb3   : > { %s5714_s10 = scalar_lea.vmem %s5713_s9, 14336  ;;  %p5715_p0 = scmp.lt.s32.totalorder %s6074_s24, %s5713_s9 }
  0xb4   : > { %p5710_p1 = pnand %p5708_p3, %p6045_p7  ;;  %p5716_p9 = scmp.lt.s32.totalorder %s5714_s10, %s5707_s21 }
  0xb6   : > { %p5711_p11 = pneg %p5710_p1  ;;  %p5717_p13 = por %p5716_p9, %p5715_p0 }
  0xb8   : > { %p5718_p5 = pnand %p5717_p13, %p5711_p11 }
  0xba   : > { %5721 = shalt.err (!%p5718_p5)
}
  0xbb   : > { %s5847_s11 = smov 64   ;;  %s5848_s8 = smov 4  }
  0xbc   : > { %4934 = dma.hbm_to_vmem [thread:$0]  (!%p6891_p6), %s6154_s4, 7168, %s6074_s24, %s6158_s28, %s5847_s11, %s5847_s11, %s5848_s8  }
  0xbd   : > { %p6893_p7 = scmp.ne.s32.totalorder %s6872_s18, 0 }
  0xbe   : > { %p6894_p12 = scmp.eq.s32.totalorder (!%p6893_p7), %s5929_s6, 0 }
  0xbf   : > { %387 = sbr.rel (%p6893_p7) target bundleno = 1351 (0x547), region = 48 }
  0xc6   : > { %5795 = dma.done.wait (%p6894_p12), [#allocation5], 448   ;;  %p6895_p10 = pmov %p6894_p12 }
  0xc7   : > { %s393_s20 = sand.u32 1, %s5929_s6   ;;  %s6190_s22 = sand.u32 1, %s5828_s12  }
  0xc8   : > { %5797 = vsyncadd (%p6895_p10), [#allocation5], 4294966848  ;;  %s6193_s13 = smul.u32 56, %s6190_s22  ;;  %s394_s25 = scalar_lea.sflag [#allocation8], %s393_s20 }
  0xc9   : > { %p6896_p6 = scmp.ne.s32.totalorder %s6869_s16, 0 }
  0xca   : > { %s6196_s24 = scalar_lea.vmem [#allocation7], %s6193_s13 }
  0xcb   : > { %5799 = dma.done.wait (%p6896_p6), %s394_s25, 44800  }
  0xcc   : > { %5801 = vsyncadd (%p6896_p6), %s394_s25, 4294922496  ;;  %s4891_s18 = smul.u32 2744, %s6190_s22  ;;  %s412_s28 = scalar_lea.sflag [#allocation11], %s393_s20 }
  0xcd   : > { %s4892_s4 = smul.u32 448, %s6190_s22 }
  0xce   : > { %s6204_s1 = scalar_lea.vmem [#allocation9], %s4891_s18 }
  0xcf   : > { %s6206_s19 = scalar_lea.vmem [#allocation10], %s4892_s4 }
  0xd0   : > { %5803 = dma.done.wait (%p6896_p6), %s412_s28, 7168  }
  0xd1   : > { %5805 = vsyncadd (%p6896_p6), %s412_s28, 4294960128  ;;  %p6897_p2 = pmov %p6895_p10 }
  0xd3   : > { %5807 = dma.done.wait (%p6897_p2), [#allocation11], 16   ;;  %p6898_p4 = pmov %p6897_p2 }
  0xd4   : > { %p6899_p8 = pmov %p6897_p2 }
  0xd5   : > { %5809 = vsyncadd (%p6898_p4), [#allocation11], 4294967280 }
  0xd6   : > { %5811 = dma.done.wait (%p6899_p8), [#allocation14], 16   ;;  %p6900_p3 = pmov %p6897_p2 }
  0xd7   : > { %v5849_v0 = vmov 0   ;;  %v4994_v1 = vld [vmem:[%s6204_s1 + $0x4] ss:$28 sps:$4 sm:$0xff]   ;;  %v5000_v5 = vld [vmem:[%s6204_s1 + $0x3c] ss:$28 sps:$4 sm:$0xff]   ;;  %vm2663_vm0 = vcmask 130048  }
  0xd8   : > { %5813 = vsyncadd (%p6900_p3), [#allocation14], 4294967280  ;;  %2822 = vmatprep.mubr.bf16.mxu1 %v5849_v0  ;;  %v4996_v2 = vld [vmem:[%s6204_s1 + $0xa84] ss:$28 sps:$4 sm:$0xff]   ;;  %2667 = vmatprep.subr.bf16.mxu0 %v4994_v1  ;;  %v5004_v7 = vld [vmem:[%s6204_s1 + $0xc] ss:$28 sps:$4 sm:$0xff]  }
  0xd9   : > { %v4998_v3 = vld [vmem:[%s6204_s1] ss:$28 sps:$4 sm:$0xff]   ;;  %2790 = vmatprep.subr.bf16.mxu1 %v4996_v2  ;;  %v5002_v6 = vld [vmem:[%s6204_s1 + $0x8] ss:$28 sps:$4 sm:$0xff]   ;;  %v5005_v8 = vld [vmem:[%s6204_s1 + $0x38] ss:$28 sps:$4 sm:$0xff]  }
  0xda   : > { %v4999_v4 = vld [vmem:[%s6204_s1 + $0xa80] ss:$28 sps:$4 sm:$0xff]   ;;  %2668 = vmatpush1.bf16.msra.mxu0 %v4998_v3  ;;  %v5006_v9 = vld [vmem:[#allocation4 + $0x18] ss:$0 sps:$4 sm:$0xff]   ;;  %v5018_v17 = vld [vmem:[%s6204_s1 + $0xa8] ss:$28 sps:$4 sm:$0xff]  }
  0xdb   : > { %2791 = vmatpush1.bf16.msra.mxu1 %v4999_v4  ;;  %2669 = vmatprep.subr.bf16.mxu0 %v5000_v5  ;;  %v5007_v10 = vld [vmem:[%s6204_s1 + $0x74] ss:$28 sps:$4 sm:$0xff]   ;;  %v5009_v11 = vld [vmem:[%s6204_s1 + $0x40] ss:$28 sps:$4 sm:$0xff]   ;;  %v5013_v14 = vld [vmem:[%s6204_s1 + $0xac] ss:$28 sps:$4 sm:$0xff]  }
  0xdc   : > { %2831 = vmatprep.subr.bf16.mxu1 %v5004_v7  ;;  %v5011_v12 = vld [vmem:[%s6204_s1 + $0x44] ss:$28 sps:$4 sm:$0xff]   ;;  %v5012_v13 = vld [vmem:[%s6204_s1 + $0x70] ss:$28 sps:$4 sm:$0xff]   ;;  %v5017_v15 = vld [vmem:[%s6204_s1 + $0x7c] ss:$28 sps:$4 sm:$0xff]  }
  0xdd   : > { %v5015_v16 = vld [vmem:[%s6204_s1 + $0x78] ss:$28 sps:$4 sm:$0xff]   ;;  %v5019_v18 = vld [vmem:[%s6204_s1 + $0xe4] ss:$28 sps:$4 sm:$0xff]   ;;  %v5021_v20 = vld [vmem:[%s6204_s1 + $0xb0] ss:$28 sps:$4 sm:$0xff]  }
  0xde   : > { %4606 = vmatmul.mubr.msk.bf16.vlgmr.msra.gmra.mrb[0].mxu1 %vm2663_vm0, %v5006_v9  ;;  %2670 = vmatpush1.bf16.msra.mxu0 %v5005_v8  ;;  %v5023_v19 = vld [vmem:[%s6204_s1 + $0xb4] ss:$28 sps:$4 sm:$0xff]   ;;  %v5024_v21 = vld [vmem:[%s6204_s1 + $0xe0] ss:$28 sps:$4 sm:$0xff]   ;;  %v5029_v23 = vld [vmem:[%s6204_s1 + $0xec] ss:$28 sps:$4 sm:$0xff]  }
  0xdf   : > { %2832 = vmatpush1.bf16.msra.mxu1 %v5002_v6  ;;  %2671 = vmatprep.subr.bf16.mxu0 %v5007_v10  ;;  %v5025_v22 = vld [vmem:[%s6204_s1 + $0x11c] ss:$28 sps:$4 sm:$0xff]   ;;  %v5027_v24 = vld [vmem:[%s6204_s1 + $0xe8] ss:$28 sps:$4 sm:$0xff]   ;;  %v5031_v26 = vld [vmem:[%s6204_s1 + $0x154] ss:$28 sps:$4 sm:$0xff]  }
  0xe0   : > { %2833 = vmatprep.subr.bf16.mxu1 %v5011_v12  ;;  %v5030_v25 = vld [vmem:[%s6204_s1 + $0x118] ss:$28 sps:$4 sm:$0xff]   ;;  %v5035_v27 = vld [vmem:[%s6204_s1 + $0x124] ss:$28 sps:$4 sm:$0xff]   ;;  %v5036_v29 = vld [vmem:[%s6204_s1 + $0x150] ss:$28 sps:$4 sm:$0xff]  }
  0xe1   : > { %v5033_v28 = vld [vmem:[%s6204_s1 + $0x120] ss:$28 sps:$4 sm:$0xff]   ;;  %v5037_v30 = vld [vmem:[%s6204_s1 + $0x18c] ss:$28 sps:$4 sm:$0xff]   ;;  %v5039_v32 = vld [vmem:[%s6204_s1 + $0x158] ss:$28 sps:$4 sm:$0xff]  }
  0xe2   : > { %2672 = vmatpush1.bf16.msra.mxu0 %v5012_v13  ;;  %v5041_v31 = vld [vmem:[%s6204_s1 + $0x15c] ss:$28 sps:$4 sm:$0xff]   ;;  %v5042_v33 = vld [vmem:[%s6204_s1 + $0x188] ss:$28 sps:$4 sm:$0xff]   ;;  %v5047_v35 = vld [vmem:[%s6204_s1 + $0x194] ss:$28 sps:$4 sm:$0xff]  }
  0xe3   : > { %2834 = vmatpush1.bf16.msra.mxu1 %v5009_v11  ;;  %2673 = vmatprep.subr.bf16.mxu0 %v5013_v14  ;;  %v5043_v34 = vld [vmem:[%s6204_s1 + $0x1c4] ss:$28 sps:$4 sm:$0xff]   ;;  %v5045_v36 = vld [vmem:[%s6204_s1 + $0x190] ss:$28 sps:$4 sm:$0xff]   ;;  %v5049_v38 = vld [vmem:[%s6204_s1 + $0x1fc] ss:$28 sps:$4 sm:$0xff]  }
  0xe4   : > { %2835 = vmatprep.subr.bf16.mxu1 %v5017_v15  ;;  %v5048_v37 = vld [vmem:[%s6204_s1 + $0x1c0] ss:$28 sps:$4 sm:$0xff]   ;;  %v5053_v39 = vld [vmem:[%s6204_s1 + $0x1cc] ss:$28 sps:$4 sm:$0xff]   ;;  %v5054_v41 = vld [vmem:[%s6204_s1 + $0x1f8] ss:$28 sps:$4 sm:$0xff]  }
  0xe5   : > { %v5051_v40 = vld [vmem:[%s6204_s1 + $0x1c8] ss:$28 sps:$4 sm:$0xff]   ;;  %v5055_v42 = vld [vmem:[%s6204_s1 + $0x234] ss:$28 sps:$4 sm:$0xff]   ;;  %v5057_v44 = vld [vmem:[%s6204_s1 + $0x200] ss:$28 sps:$4 sm:$0xff]  }
  0xe6   : > { %2674 = vmatpush1.bf16.msra.mxu0 %v5018_v17  ;;  %v5059_v43 = vld [vmem:[%s6204_s1 + $0x204] ss:$28 sps:$4 sm:$0xff]   ;;  %v5060_v45 = vld [vmem:[%s6204_s1 + $0x230] ss:$28 sps:$4 sm:$0xff]   ;;  %v5065_v47 = vld [vmem:[%s6204_s1 + $0x23c] ss:$28 sps:$4 sm:$0xff]  }
  0xe7   : > { %2836 = vmatpush1.bf16.msra.mxu1 %v5015_v16  ;;  %2675 = vmatprep.subr.bf16.mxu0 %v5019_v18  ;;  %v5061_v46 = vld [vmem:[%s6204_s1 + $0x26c] ss:$28 sps:$4 sm:$0xff]   ;;  %v5063_v48 = vld [vmem:[%s6204_s1 + $0x238] ss:$28 sps:$4 sm:$0xff]   ;;  %v5067_v51 = vld [vmem:[%s6204_s1 + $0x2a4] ss:$28 sps:$4 sm:$0xff]  }
  0xe8   : > { %2837 = vmatprep.subr.bf16.mxu1 %v5023_v19  ;;  %v479_v49 = vld [vmem:[#allocation4] sm:$0xff]  ;;  %v5066_v50 = vld [vmem:[%s6204_s1 + $0x268] ss:$28 sps:$4 sm:$0xff]   ;;  %v5069_v54 = vld [vmem:[%s6204_s1 + $0x270] ss:$28 sps:$4 sm:$0xff]   ;;  %vm5851_vm1 = vmmov 0  }
  0xe9   : > { %v6271_v52 = vcombine.high %v479_v49, %v479_v49  ;;  %v5071_v53 = vld [vmem:[%s6204_s1 + $0x274] ss:$28 sps:$4 sm:$0xff]   ;;  %v5072_v55 = vld [vmem:[%s6204_s1 + $0x2a0] ss:$28 sps:$4 sm:$0xff]   ;;  %v5077_v57 = vld [vmem:[%s6204_s1 + $0x2ac] ss:$28 sps:$4 sm:$0xff]   ;;  %v6293_v8 = vcombine.low %v479_v49, %v479_v49 }
  0xea   : > { %2676 = vmatpush1.bf16.msra.mxu0 %v5024_v21  ;;  %v5073_v56 = vld [vmem:[%s6204_s1 + $0x2dc] ss:$28 sps:$4 sm:$0xff]   ;;  %v5075_v58 = vld [vmem:[%s6204_s1 + $0x2a8] ss:$28 sps:$4 sm:$0xff]   ;;  %v5079_v60 = vld [vmem:[%s6204_s1 + $0x314] ss:$28 sps:$4 sm:$0xff]  }
  0xeb   : > { %2838 = vmatpush1.bf16.msra.mxu1 %v5021_v20  ;;  %2677 = vmatprep.subr.bf16.mxu0 %v5025_v22  ;;  %v5078_v59 = vld [vmem:[%s6204_s1 + $0x2d8] ss:$28 sps:$4 sm:$0xff]   ;;  %v5083_v61 = vld [vmem:[%s6204_s1 + $0x2e4] ss:$28 sps:$4 sm:$0xff]   ;;  %v5084_v63 = vld [vmem:[%s6204_s1 + $0x310] ss:$28 sps:$4 sm:$0xff]  }
  0xec   : > { %2839 = vmatprep.subr.bf16.mxu1 %v5029_v23  ;;  %2699 = vmatprep.mubr.bf16.mxu0 %v6271_v52  ;;  %v5081_v62 = vld [vmem:[%s6204_s1 + $0x2e0] ss:$28 sps:$4 sm:$0xff]   ;;  %v5085_v1 = vld [vmem:[%s6204_s1 + $0x34c] ss:$28 sps:$4 sm:$0xff]   ;;  %v5087_v3 = vld [vmem:[%s6204_s1 + $0x318] ss:$28 sps:$4 sm:$0xff]  }
  0xed   : > { %2863 = vmatprep.mubr.bf16.mxu1 %v6271_v52  ;;  %v5089_v2 = vld [vmem:[%s6204_s1 + $0x31c] ss:$28 sps:$4 sm:$0xff]   ;;  %v5090_v4 = vld [vmem:[%s6204_s1 + $0x348] ss:$28 sps:$4 sm:$0xff]   ;;  %v5097_v6 = vld [vmem:[%s6204_s1 + $0x354] ss:$28 sps:$4 sm:$0xff]  }
  0xee   : > { %2678 = vmatpush1.bf16.msra.mxu0 %v5030_v25  ;;  %v5094_v5 = vld [vmem:[%s6204_s1 + $0x384] ss:$28 sps:$4 sm:$0xff]   ;;  %v5095_v9 = vld [vmem:[%s6204_s1 + $0x350] ss:$28 sps:$4 sm:$0xff]   ;;  %v5101_v10 = vld [vmem:[%s6204_s1 + $0x3bc] ss:$28 sps:$4 sm:$0xff]  }
  0xef   : > { %2840 = vmatpush1.bf16.msra.mxu1 %v5027_v24  ;;  %2679 = vmatprep.subr.bf16.mxu0 %v5031_v26  ;;  %v5092_v7 = vld [vmem:[%s6204_s1 + $0x380] ss:$28 sps:$4 sm:$0xff]   ;;  %v5104_v11 = vld [vmem:[%s6204_s1 + $0x38c] ss:$28 sps:$4 sm:$0xff]   ;;  %v5099_v12 = vld [vmem:[%s6204_s1 + $0x3b8] ss:$28 sps:$4 sm:$0xff]  }
  0xf0   : > { %2841 = vmatprep.subr.bf16.mxu1 %v5035_v27  ;;  %v5102_v13 = vld [vmem:[%s6204_s1 + $0x388] ss:$28 sps:$4 sm:$0xff]   ;;  %v5107_v14 = vld [vmem:[%s6204_s1 + $0x3f4] ss:$28 sps:$4 sm:$0xff]   ;;  %v5108_v17 = vld [vmem:[%s6204_s1 + $0x3c0] ss:$28 sps:$4 sm:$0xff]  }
  0xf1   : > { %v5110_v15 = vld [vmem:[%s6204_s1 + $0x3c4] ss:$28 sps:$4 sm:$0xff]   ;;  %v5105_v16 = vld [vmem:[%s6204_s1 + $0x3f0] ss:$28 sps:$4 sm:$0xff]   ;;  %v5116_v19 = vld [vmem:[%s6204_s1 + $0x3fc] ss:$28 sps:$4 sm:$0xff]  }
  0xf2   : > { %2680 = vmatpush1.bf16.msra.mxu0 %v5036_v29  ;;  %v5113_v18 = vld [vmem:[%s6204_s1 + $0x42c] ss:$28 sps:$4 sm:$0xff]   ;;  %v5114_v21 = vld [vmem:[%s6204_s1 + $0x3f8] ss:$28 sps:$4 sm:$0xff]   ;;  %v5119_v22 = vld [vmem:[%s6204_s1 + $0x464] ss:$28 sps:$4 sm:$0xff]  }
  0xf3   : > { %2842 = vmatpush1.bf16.msra.mxu1 %v5033_v28  ;;  %2681 = vmatprep.subr.bf16.mxu0 %v5037_v30  ;;  %v5111_v20 = vld [vmem:[%s6204_s1 + $0x428] ss:$28 sps:$4 sm:$0xff]   ;;  %v5122_v23 = vld [vmem:[%s6204_s1 + $0x434] ss:$28 sps:$4 sm:$0xff]   ;;  %v5117_v24 = vld [vmem:[%s6204_s1 + $0x460] ss:$28 sps:$4 sm:$0xff]  }
  0xf4   : > { %2843 = vmatprep.subr.bf16.mxu1 %v5041_v31  ;;  %v5120_v25 = vld [vmem:[%s6204_s1 + $0x430] ss:$28 sps:$4 sm:$0xff]   ;;  %v5125_v26 = vld [vmem:[%s6204_s1 + $0x49c] ss:$28 sps:$4 sm:$0xff]   ;;  %v5126_v29 = vld [vmem:[%s6204_s1 + $0x468] ss:$28 sps:$4 sm:$0xff]  }
  0xf5   : > { %v5128_v27 = vld [vmem:[%s6204_s1 + $0x46c] ss:$28 sps:$4 sm:$0xff]   ;;  %v5123_v28 = vld [vmem:[%s6204_s1 + $0x498] ss:$28 sps:$4 sm:$0xff]   ;;  %v5134_v31 = vld [vmem:[%s6204_s1 + $0x4a4] ss:$28 sps:$4 sm:$0xff]  }
  0xf6   : > { %2682 = vmatpush1.bf16.msra.mxu0 %v5042_v33  ;;  %v5131_v30 = vld [vmem:[%s6204_s1 + $0x4d4] ss:$28 sps:$4 sm:$0xff]   ;;  %v5158_v49 = vld [vmem:[%s6204_s1 + $0x584] ss:$28 sps:$4 sm:$0xff]   ;;  %s6635_s16 = scalar_lea.vmem [#allocation16], %s6193_s13  ;;  %s6644_s15 = scalar_lea.vmem [#allocation15], %s6193_s13 }
  0xf7   : > { %2844 = vmatpush1.bf16.msra.mxu1 %v5039_v32  ;;  %2683 = vmatprep.subr.bf16.mxu0 %v5043_v34  ;;  %v6320_v32 = vld [vmem:[#allocation4 + $0x8] sm:$0xff]  ;;  %v5129_v33 = vld [vmem:[%s6204_s1 + $0x4d0] ss:$28 sps:$4 sm:$0xff]   ;;  %p6901_p1 = scmp.ne.s32.totalorder %s5929_s6, 0 }
  0xf8   : > { %2845 = vmatprep.subr.bf16.mxu1 %v5047_v35  ;;  %v5132_v34 = vld [vmem:[%s6204_s1 + $0x4a0] ss:$28 sps:$4 sm:$0xff]   ;;  %v6326_v35 = vcombine.high %v6320_v32, %v6320_v32 }
  0xfa   : > { %2684 = vmatpush1.bf16.msra.mxu0 %v5048_v37  ;;  %v5140_v37 = vld [vmem:[%s6204_s1 + $0x4dc] ss:$28 sps:$4 sm:$0xff]  }
  0xfb   : > { %2846 = vmatpush1.bf16.msra.mxu1 %v5045_v36  ;;  %2685 = vmatprep.subr.bf16.mxu0 %v5049_v38  ;;  %v5137_v36 = vld [vmem:[%s6204_s1 + $0x50c] ss:$28 sps:$4 sm:$0xff]  }
  0xfc   : > { %2847 = vmatprep.subr.bf16.mxu1 %v5053_v39  ;;  %v5135_v38 = vld [vmem:[%s6204_s1 + $0x508] ss:$28 sps:$4 sm:$0xff]   ;;  %v5138_v39 = vld [vmem:[%s6204_s1 + $0x4d8] ss:$28 sps:$4 sm:$0xff]  }
  0xfe   : > { %2686 = vmatpush1.bf16.msra.mxu0 %v5054_v41  ;;  %v5146_v41 = vld [vmem:[%s6204_s1 + $0x514] ss:$28 sps:$4 sm:$0xff]  }
  0xff   : > { %2848 = vmatpush1.bf16.msra.mxu1 %v5051_v40  ;;  %2687 = vmatprep.subr.bf16.mxu0 %v5055_v42  ;;  %v5143_v40 = vld [vmem:[%s6204_s1 + $0x544] ss:$28 sps:$4 sm:$0xff]  }
 0x100   : > { %2849 = vmatprep.subr.bf16.mxu1 %v5059_v43  ;;  %v5141_v42 = vld [vmem:[%s6204_s1 + $0x540] ss:$28 sps:$4 sm:$0xff]   ;;  %v5144_v43 = vld [vmem:[%s6204_s1 + $0x510] ss:$28 sps:$4 sm:$0xff]  }
 0x102   : > { %2688 = vmatpush1.bf16.msra.mxu0 %v5060_v45  ;;  %v5152_v45 = vld [vmem:[%s6204_s1 + $0x54c] ss:$28 sps:$4 sm:$0xff]  }
 0x103   : > { %2850 = vmatpush1.bf16.msra.mxu1 %v5057_v44  ;;  %2689 = vmatprep.subr.bf16.mxu0 %v5061_v46  ;;  %v5149_v44 = vld [vmem:[%s6204_s1 + $0x57c] ss:$28 sps:$4 sm:$0xff]  }
 0x104   : > { %2851 = vmatprep.subr.bf16.mxu1 %v5065_v47  ;;  %v5147_v46 = vld [vmem:[%s6204_s1 + $0x578] ss:$28 sps:$4 sm:$0xff]   ;;  %v5150_v47 = vld [vmem:[%s6204_s1 + $0x548] ss:$28 sps:$4 sm:$0xff]  }
 0x106   : > { %2690 = vmatpush1.bf16.msra.mxu0 %v5066_v50  ;;  %v5153_v50 = vld [vmem:[%s6204_s1 + $0x5b0] ss:$28 sps:$4 sm:$0xff]  }
 0x107   : > { %2852 = vmatpush1.bf16.msra.mxu1 %v5063_v48  ;;  %2691 = vmatprep.subr.bf16.mxu0 %v5067_v51  ;;  %v5155_v48 = vld [vmem:[%s6204_s1 + $0x5b4] ss:$28 sps:$4 sm:$0xff]   ;;  %v5156_v51 = vld [vmem:[%s6204_s1 + $0x580] ss:$28 sps:$4 sm:$0xff]  }
 0x108   : > { %2853 = vmatprep.subr.bf16.mxu1 %v5071_v53  ;;  %v5161_v53 = vld [vmem:[%s6204_s1 + $0x5ec] ss:$28 sps:$4 sm:$0xff]  }
 0x10a   : > { %2692 = vmatpush1.bf16.msra.mxu0 %v5072_v55  ;;  %v5159_v55 = vld [vmem:[%s6204_s1 + $0x5e8] ss:$28 sps:$4 sm:$0xff]  }
 0x10b   : > { %2854 = vmatpush1.bf16.msra.mxu1 %v5069_v54  ;;  %2693 = vmatprep.subr.bf16.mxu0 %v5073_v56  ;;  %v5164_v54 = vld [vmem:[%s6204_s1 + $0x5bc] ss:$28 sps:$4 sm:$0xff]  }
 0x10c   : > { %2855 = vmatprep.subr.bf16.mxu1 %v5077_v57  ;;  %v5162_v56 = vld [vmem:[%s6204_s1 + $0x5b8] ss:$28 sps:$4 sm:$0xff]   ;;  %v5167_v57 = vld [vmem:[%s6204_s1 + $0x624] ss:$28 sps:$4 sm:$0xff]  }
 0x10e   : > { %2694 = vmatpush1.bf16.msra.mxu0 %v5078_v59  ;;  %v5165_v59 = vld [vmem:[%s6204_s1 + $0x620] ss:$28 sps:$4 sm:$0xff]  }
 0x10f   : > { %2856 = vmatpush1.bf16.msra.mxu1 %v5075_v58  ;;  %2695 = vmatprep.subr.bf16.mxu0 %v5079_v60  ;;  %v5170_v58 = vld [vmem:[%s6204_s1 + $0x5f4] ss:$28 sps:$4 sm:$0xff]  }
 0x110   : > { %2857 = vmatprep.subr.bf16.mxu1 %v5083_v61  ;;  %v5168_v60 = vld [vmem:[%s6204_s1 + $0x5f0] ss:$28 sps:$4 sm:$0xff]   ;;  %v5173_v61 = vld [vmem:[%s6204_s1 + $0x65c] ss:$28 sps:$4 sm:$0xff]  }
 0x112   : > { %2696 = vmatpush1.bf16.msra.mxu0 %v5084_v63  ;;  %v5171_v63 = vld [vmem:[%s6204_s1 + $0x658] ss:$28 sps:$4 sm:$0xff]  }
 0x113   : > { %2858 = vmatpush1.bf16.msra.mxu1 %v5081_v62  ;;  %2697 = vmatprep.subr.bf16.mxu0 %v5085_v1  ;;  %v5176_v62 = vld [vmem:[%s6204_s1 + $0x62c] ss:$28 sps:$4 sm:$0xff]  }
 0x114   : > { %2859 = vmatprep.subr.bf16.mxu1 %v5089_v2  ;;  %v5174_v1 = vld [vmem:[%s6204_s1 + $0x628] ss:$28 sps:$4 sm:$0xff]   ;;  %v5179_v2 = vld [vmem:[%s6204_s1 + $0x694] ss:$28 sps:$4 sm:$0xff]  }
 0x116   : > { %2698 = vmatpush1.bf16.msra.mxu0 %v5090_v4  ;;  %v5177_v4 = vld [vmem:[%s6204_s1 + $0x690] ss:$28 sps:$4 sm:$0xff]  }
 0x117   : > { %2860 = vmatpush1.bf16.msra.mxu1 %v5087_v3  ;;  %2708 = vmatprep.subr.bf16.mxu0 %v5094_v5  ;;  %v5182_v3 = vld [vmem:[%s6204_s1 + $0x664] ss:$28 sps:$4 sm:$0xff]  }
 0x118   : > { %2861 = vmatprep.subr.bf16.mxu1 %v5097_v6  ;;  %v5180_v5 = vld [vmem:[%s6204_s1 + $0x660] ss:$28 sps:$4 sm:$0xff]   ;;  %v5185_v6 = vld [vmem:[%s6204_s1 + $0x6cc] ss:$28 sps:$4 sm:$0xff]  }
 0x119   : > { %2700 = vmatmul.mubr.bf16.vlgmr.msra.gmra.mrb[0].mxu0 %v6293_v8 }
 0x11a   : > { %2709 = vmatpush1.bf16.msra.mxu0 %v5092_v7  ;;  %2740 = vmatprep.mubr.bf16.mxu0 %v6326_v35  ;;  %v5188_v7 = vld [vmem:[%s6204_s1 + $0x69c] ss:$28 sps:$4 sm:$0xff]  }
 0x11b   : > { %2862 = vmatpush1.bf16.msra.mxu1 %v5095_v9  ;;  %2710 = vmatprep.subr.bf16.mxu0 %v5101_v10  ;;  %v5183_v9 = vld [vmem:[%s6204_s1 + $0x6c8] ss:$28 sps:$4 sm:$0xff]   ;;  %v5186_v10 = vld [vmem:[%s6204_s1 + $0x698] ss:$28 sps:$4 sm:$0xff]  }
 0x11c   : > { %2872 = vmatprep.subr.bf16.mxu1 %v5104_v11  ;;  %v5192_v11 = vld [vmem:[%s6204_s1 + $0x704] ss:$28 sps:$4 sm:$0xff]  }
 0x11e   : > { %2864 = vmatmul.mubr.bf16.vlgmr.msra.gmra.mrb[4].mxu1 %v6293_v8  ;;  %2711 = vmatpush1.bf16.msra.mxu0 %v5099_v12  ;;  %v5195_v12 = vld [vmem:[%s6204_s1 + $0x6d4] ss:$28 sps:$4 sm:$0xff]  }
 0x11f   : > { %2873 = vmatpush1.bf16.msra.mxu1 %v5102_v13  ;;  %2712 = vmatprep.subr.bf16.mxu0 %v5107_v14  ;;  %v5190_v13 = vld [vmem:[%s6204_s1 + $0x700] ss:$28 sps:$4 sm:$0xff]   ;;  %v5193_v14 = vld [vmem:[%s6204_s1 + $0x6d0] ss:$28 sps:$4 sm:$0xff]  }
 0x120   : > { %2874 = vmatprep.subr.bf16.mxu1 %v5110_v15  ;;  %2904 = vmatprep.mubr.bf16.mxu1 %v6326_v35  ;;  %v6372_v15 = vcombine.low %v6320_v32, %v6320_v32  ;;  %v5215_v32 = vld [vmem:[%s6204_s1 + $0x7e0] ss:$28 sps:$4 sm:$0xff]  }
 0x122   : > { %2713 = vmatpush1.bf16.msra.mxu0 %v5105_v16  ;;  %v5199_v16 = vld [vmem:[%s6204_s1 + $0x73c] ss:$28 sps:$4 sm:$0xff]  }
 0x123   : > { %2875 = vmatpush1.bf16.msra.mxu1 %v5108_v17  ;;  %2714 = vmatprep.subr.bf16.mxu0 %v5113_v18  ;;  %v5202_v17 = vld [vmem:[%s6204_s1 + $0x70c] ss:$28 sps:$4 sm:$0xff]  }
 0x124   : > { %2876 = vmatprep.subr.bf16.mxu1 %v5116_v19  ;;  %v6376_v18 = vld [vmem:[#allocation4 + $0x10] sm:$0xff] }
 0x125   : > { %v6380_v19 = vcombine.high %v6376_v18, %v6376_v18 }
 0x126   : > { %2715 = vmatpush1.bf16.msra.mxu0 %v5111_v20  ;;  %v5197_v20 = vld [vmem:[%s6204_s1 + $0x738] ss:$28 sps:$4 sm:$0xff]  }
 0x127   : > { %2877 = vmatpush1.bf16.msra.mxu1 %v5114_v21  ;;  %2716 = vmatprep.subr.bf16.mxu0 %v5119_v22  ;;  %v5200_v21 = vld [vmem:[%s6204_s1 + $0x708] ss:$28 sps:$4 sm:$0xff]   ;;  %v5205_v22 = vld [vmem:[%s6204_s1 + $0x774] ss:$28 sps:$4 sm:$0xff]  }
 0x128   : > { %2878 = vmatprep.subr.bf16.mxu1 %v5122_v23  ;;  %v5208_v23 = vld [vmem:[%s6204_s1 + $0x744] ss:$28 sps:$4 sm:$0xff]  }
 0x12a   : > { %2717 = vmatpush1.bf16.msra.mxu0 %v5117_v24  ;;  %v5203_v24 = vld [vmem:[%s6204_s1 + $0x770] ss:$28 sps:$4 sm:$0xff]  }
 0x12b   : > { %2879 = vmatpush1.bf16.msra.mxu1 %v5120_v25  ;;  %2718 = vmatprep.subr.bf16.mxu0 %v5125_v26  ;;  %v5206_v25 = vld [vmem:[%s6204_s1 + $0x740] ss:$28 sps:$4 sm:$0xff]   ;;  %v5211_v26 = vld [vmem:[%s6204_s1 + $0x7ac] ss:$28 sps:$4 sm:$0xff]  }
 0x12c   : > { %2880 = vmatprep.subr.bf16.mxu1 %v5128_v27  ;;  %v5214_v27 = vld [vmem:[%s6204_s1 + $0x77c] ss:$28 sps:$4 sm:$0xff]  }
 0x12e   : > { %2719 = vmatpush1.bf16.msra.mxu0 %v5123_v28  ;;  %v5209_v28 = vld [vmem:[%s6204_s1 + $0x7a8] ss:$28 sps:$4 sm:$0xff]  }
 0x12f   : > { %2881 = vmatpush1.bf16.msra.mxu1 %v5126_v29  ;;  %2720 = vmatprep.subr.bf16.mxu0 %v5131_v30  ;;  %v5212_v29 = vld [vmem:[%s6204_s1 + $0x778] ss:$28 sps:$4 sm:$0xff]   ;;  %v5217_v30 = vld [vmem:[%s6204_s1 + $0x7e4] ss:$28 sps:$4 sm:$0xff]  }
 0x130   : > { %2882 = vmatprep.subr.bf16.mxu1 %v5134_v31  ;;  %v5220_v31 = vld [vmem:[%s6204_s1 + $0x7b4] ss:$28 sps:$4 sm:$0xff]  }
 0x132   : > { %2721 = vmatpush1.bf16.msra.mxu0 %v5129_v33  ;;  %v5218_v33 = vld [vmem:[%s6204_s1 + $0x7b0] ss:$28 sps:$4 sm:$0xff]  }
 0x133   : > { %2883 = vmatpush1.bf16.msra.mxu1 %v5132_v34  ;;  %2722 = vmatprep.subr.bf16.mxu0 %v5137_v36  ;;  %v5223_v34 = vld [vmem:[%s6204_s1 + $0x81c] ss:$28 sps:$4 sm:$0xff]   ;;  %v5226_v36 = vld [vmem:[%s6204_s1 + $0x7ec] ss:$28 sps:$4 sm:$0xff]  }
 0x134   : > { %2884 = vmatprep.subr.bf16.mxu1 %v5140_v37  ;;  %v5221_v37 = vld [vmem:[%s6204_s1 + $0x818] ss:$28 sps:$4 sm:$0xff]  }
 0x136   : > { %2723 = vmatpush1.bf16.msra.mxu0 %v5135_v38  ;;  %v5224_v38 = vld [vmem:[%s6204_s1 + $0x7e8] ss:$28 sps:$4 sm:$0xff]  }
 0x137   : > { %2885 = vmatpush1.bf16.msra.mxu1 %v5138_v39  ;;  %2724 = vmatprep.subr.bf16.mxu0 %v5143_v40  ;;  %v5229_v39 = vld [vmem:[%s6204_s1 + $0x854] ss:$28 sps:$4 sm:$0xff]   ;;  %v5232_v40 = vld [vmem:[%s6204_s1 + $0x824] ss:$28 sps:$4 sm:$0xff]  }
 0x138   : > { %2886 = vmatprep.subr.bf16.mxu1 %v5146_v41  ;;  %v5227_v41 = vld [vmem:[%s6204_s1 + $0x850] ss:$28 sps:$4 sm:$0xff]  }
 0x13a   : > { %2725 = vmatpush1.bf16.msra.mxu0 %v5141_v42  ;;  %v5230_v42 = vld [vmem:[%s6204_s1 + $0x820] ss:$28 sps:$4 sm:$0xff]  }
 0x13b   : > { %2887 = vmatpush1.bf16.msra.mxu1 %v5144_v43  ;;  %2726 = vmatprep.subr.bf16.mxu0 %v5149_v44  ;;  %v5235_v43 = vld [vmem:[%s6204_s1 + $0x88c] ss:$28 sps:$4 sm:$0xff]   ;;  %v5238_v44 = vld [vmem:[%s6204_s1 + $0x85c] ss:$28 sps:$4 sm:$0xff]  }
 0x13c   : > { %2888 = vmatprep.subr.bf16.mxu1 %v5152_v45  ;;  %v5233_v45 = vld [vmem:[%s6204_s1 + $0x888] ss:$28 sps:$4 sm:$0xff]  }
 0x13e   : > { %2727 = vmatpush1.bf16.msra.mxu0 %v5147_v46  ;;  %v5236_v46 = vld [vmem:[%s6204_s1 + $0x858] ss:$28 sps:$4 sm:$0xff]  }
 0x13f   : > { %2889 = vmatpush1.bf16.msra.mxu1 %v5150_v47  ;;  %2728 = vmatprep.subr.bf16.mxu0 %v5155_v48  ;;  %v5241_v47 = vld [vmem:[%s6204_s1 + $0x8c4] ss:$28 sps:$4 sm:$0xff]   ;;  %v5244_v48 = vld [vmem:[%s6204_s1 + $0x894] ss:$28 sps:$4 sm:$0xff]  }
 0x140   : > { %2890 = vmatprep.subr.bf16.mxu1 %v5158_v49  ;;  %v5239_v49 = vld [vmem:[%s6204_s1 + $0x8c0] ss:$28 sps:$4 sm:$0xff]  }
 0x142   : > { %2729 = vmatpush1.bf16.msra.mxu0 %v5153_v50  ;;  %v5242_v50 = vld [vmem:[%s6204_s1 + $0x890] ss:$28 sps:$4 sm:$0xff]  }
 0x143   : > { %2891 = vmatpush1.bf16.msra.mxu1 %v5156_v51  ;;  %2730 = vmatprep.subr.bf16.mxu0 %v5161_v53  ;;  %v5247_v51 = vld [vmem:[%s6204_s1 + $0x8fc] ss:$28 sps:$4 sm:$0xff]   ;;  %v5250_v53 = vld [vmem:[%s6204_s1 + $0x8cc] ss:$28 sps:$4 sm:$0xff]  }
 0x144   : > { %2892 = vmatprep.subr.bf16.mxu1 %v5164_v54  ;;  %v5245_v54 = vld [vmem:[%s6204_s1 + $0x8f8] ss:$28 sps:$4 sm:$0xff]  }
 0x146   : > { %2731 = vmatpush1.bf16.msra.mxu0 %v5159_v55  ;;  %v5248_v55 = vld [vmem:[%s6204_s1 + $0x8c8] ss:$28 sps:$4 sm:$0xff]  }
 0x147   : > { %2893 = vmatpush1.bf16.msra.mxu1 %v5162_v56  ;;  %2732 = vmatprep.subr.bf16.mxu0 %v5167_v57  ;;  %v5253_v56 = vld [vmem:[%s6204_s1 + $0x934] ss:$28 sps:$4 sm:$0xff]   ;;  %v5256_v57 = vld [vmem:[%s6204_s1 + $0x904] ss:$28 sps:$4 sm:$0xff]  }
 0x148   : > { %2894 = vmatprep.subr.bf16.mxu1 %v5170_v58  ;;  %v5251_v58 = vld [vmem:[%s6204_s1 + $0x930] ss:$28 sps:$4 sm:$0xff]  }
 0x14a   : > { %2733 = vmatpush1.bf16.msra.mxu0 %v5165_v59  ;;  %v5254_v59 = vld [vmem:[%s6204_s1 + $0x900] ss:$28 sps:$4 sm:$0xff]  }
 0x14b   : > { %2895 = vmatpush1.bf16.msra.mxu1 %v5168_v60  ;;  %2734 = vmatprep.subr.bf16.mxu0 %v5173_v61  ;;  %v5259_v60 = vld [vmem:[%s6204_s1 + $0x96c] ss:$28 sps:$4 sm:$0xff]   ;;  %v5262_v61 = vld [vmem:[%s6204_s1 + $0x93c] ss:$28 sps:$4 sm:$0xff]  }
 0x14c   : > { %2896 = vmatprep.subr.bf16.mxu1 %v5176_v62  ;;  %v5257_v62 = vld [vmem:[%s6204_s1 + $0x968] ss:$28 sps:$4 sm:$0xff]  }
 0x14e   : > { %2735 = vmatpush1.bf16.msra.mxu0 %v5171_v63  ;;  %v5260_v63 = vld [vmem:[%s6204_s1 + $0x938] ss:$28 sps:$4 sm:$0xff]  }
 0x14f   : > { %2897 = vmatpush1.bf16.msra.mxu1 %v5174_v1  ;;  %2736 = vmatprep.subr.bf16.mxu0 %v5179_v2  ;;  %v5265_v1 = vld [vmem:[%s6204_s1 + $0x9a4] ss:$28 sps:$4 sm:$0xff]   ;;  %v5268_v2 = vld [vmem:[%s6204_s1 + $0x974] ss:$28 sps:$4 sm:$0xff]  }
 0x150   : > { %2898 = vmatprep.subr.bf16.mxu1 %v5182_v3  ;;  %v5263_v3 = vld [vmem:[%s6204_s1 + $0x9a0] ss:$28 sps:$4 sm:$0xff]  }
 0x152   : > { %2737 = vmatpush1.bf16.msra.mxu0 %v5177_v4  ;;  %v5266_v4 = vld [vmem:[%s6204_s1 + $0x970] ss:$28 sps:$4 sm:$0xff]  }
 0x153   : > { %2899 = vmatpush1.bf16.msra.mxu1 %v5180_v5  ;;  %2738 = vmatprep.subr.bf16.mxu0 %v5185_v6  ;;  %v5271_v5 = vld [vmem:[%s6204_s1 + $0x9dc] ss:$28 sps:$4 sm:$0xff]   ;;  %v5274_v6 = vld [vmem:[%s6204_s1 + $0x9ac] ss:$28 sps:$4 sm:$0xff]  }
 0x154   : > { %2900 = vmatprep.subr.bf16.mxu1 %v5188_v7  ;;  %v5269_v7 = vld [vmem:[%s6204_s1 + $0x9d8] ss:$28 sps:$4 sm:$0xff]  }
 0x156   : > { %2739 = vmatpush1.bf16.msra.mxu0 %v5183_v9  ;;  %v5272_v9 = vld [vmem:[%s6204_s1 + $0x9a8] ss:$28 sps:$4 sm:$0xff]  }
 0x157   : > { %2901 = vmatpush1.bf16.msra.mxu1 %v5186_v10  ;;  %2749 = vmatprep.subr.bf16.mxu0 %v5192_v11  ;;  %v5277_v10 = vld [vmem:[%s6204_s1 + $0xa14] ss:$28 sps:$4 sm:$0xff]   ;;  %v5280_v11 = vld [vmem:[%s6204_s1 + $0x9e4] ss:$28 sps:$4 sm:$0xff]  }
 0x158   : > { %2902 = vmatprep.subr.bf16.mxu1 %v5195_v12  ;;  %v5275_v12 = vld [vmem:[%s6204_s1 + $0xa10] ss:$28 sps:$4 sm:$0xff]  }
 0x159   : > { %2741 = vmatmul.mubr.bf16.vlgmr.msra.gmra.mrb[0].mxu0 %v6372_v15 }
 0x15a   : > { %2750 = vmatpush1.bf16.msra.mxu0 %v5190_v13  ;;  %2781 = vmatprep.mubr.bf16.mxu0 %v6380_v19  ;;  %v5278_v13 = vld [vmem:[%s6204_s1 + $0x9e0] ss:$28 sps:$4 sm:$0xff]  }
 0x15b   : > { %2903 = vmatpush1.bf16.msra.mxu1 %v5193_v14  ;;  %2751 = vmatprep.subr.bf16.mxu0 %v5199_v16  ;;  %v5283_v14 = vld [vmem:[%s6204_s1 + $0xa4c] ss:$28 sps:$4 sm:$0xff]   ;;  %v5286_v16 = vld [vmem:[%s6204_s1 + $0xa1c] ss:$28 sps:$4 sm:$0xff]  }
 0x15c   : > { %2913 = vmatprep.subr.bf16.mxu1 %v5202_v17  ;;  %v5281_v17 = vld [vmem:[%s6204_s1 + $0xa48] ss:$28 sps:$4 sm:$0xff]  }
 0x15e   : > { %2905 = vmatmul.mubr.bf16.vlgmr.msra.gmra.mrb[4].mxu1 %v6372_v15  ;;  %2752 = vmatpush1.bf16.msra.mxu0 %v5197_v20  ;;  %v5284_v20 = vld [vmem:[%s6204_s1 + $0xa18] ss:$28 sps:$4 sm:$0xff]  }
 0x15f   : > { %2914 = vmatpush1.bf16.msra.mxu1 %v5200_v21  ;;  %2753 = vmatprep.subr.bf16.mxu0 %v5205_v22  ;;  %v5291_v21 = vld [vmem:[%s6204_s1 + $0xa54] ss:$28 sps:$4 sm:$0xff]  }
 0x160   : > { %2915 = vmatprep.subr.bf16.mxu1 %v5208_v23  ;;  %2945 = vmatprep.mubr.bf16.mxu1 %v6380_v19  ;;  %v5294_v22 = vld [vmem:[%s6204_s1 + $0x14] ss:$28 sps:$4 sm:$0xff]   ;;  %v6448_v23 = vcombine.low %v6376_v18, %v6376_v18  ;;  %v5300_v18 = vld [vmem:[%s6204_s1 + $0x84] ss:$28 sps:$4 sm:$0xff]  }
 0x162   : > { %2754 = vmatpush1.bf16.msra.mxu0 %v5203_v24  ;;  %v5289_v24 = vld [vmem:[%s6204_s1 + $0xa50] ss:$28 sps:$4 sm:$0xff]  }
 0x163   : > { %2916 = vmatpush1.bf16.msra.mxu1 %v5206_v25  ;;  %2755 = vmatprep.subr.bf16.mxu0 %v5211_v26  ;;  %v5292_v25 = vld [vmem:[%s6204_s1 + $0x10] ss:$28 sps:$4 sm:$0xff]  }
 0x164   : > { %2917 = vmatprep.subr.bf16.mxu1 %v5214_v27  ;;  %v5297_v26 = vld [vmem:[%s6204_s1 + $0x4c] ss:$28 sps:$4 sm:$0xff]  }
 0x165   : > { %v5303_v27 = vld [vmem:[%s6204_s1 + $0xa8c] ss:$28 sps:$4 sm:$0xff]  }
 0x166   : > { %2756 = vmatpush1.bf16.msra.mxu0 %v5209_v28  ;;  %v5295_v28 = vld [vmem:[%s6204_s1 + $0x48] ss:$28 sps:$4 sm:$0xff]  }
 0x167   : > { %2918 = vmatpush1.bf16.msra.mxu1 %v5212_v29  ;;  %2757 = vmatprep.subr.bf16.mxu0 %v5217_v30  ;;  %v5301_v29 = vld [vmem:[%s6204_s1 + $0xa88] ss:$28 sps:$4 sm:$0xff]   ;;  %v5312_v30 = vld [vmem:[%s6204_s1 + $0xa94] ss:$28 sps:$4 sm:$0xff]  }
 0x168   : > { %2919 = vmatprep.subr.bf16.mxu1 %v5220_v31  ;;  %v5298_v31 = vld [vmem:[%s6204_s1 + $0x80] ss:$28 sps:$4 sm:$0xff]  }
 0x16a   : > { %2758 = vmatpush1.bf16.msra.mxu0 %v5215_v32  ;;  %v5306_v32 = vld [vmem:[%s6204_s1 + $0xbc] ss:$28 sps:$4 sm:$0xff]  }
 0x16b   : > { %2920 = vmatpush1.bf16.msra.mxu1 %v5218_v33  ;;  %2759 = vmatprep.subr.bf16.mxu0 %v5223_v34  ;;  %v5304_v33 = vld [vmem:[%s6204_s1 + $0xb8] ss:$28 sps:$4 sm:$0xff]  }
 0x16c   : > { %2921 = vmatprep.subr.bf16.mxu1 %v5226_v36  ;;  %v5309_v34 = vld [vmem:[%s6204_s1 + $0xf4] ss:$28 sps:$4 sm:$0xff]  }
 0x16d   : > { %v5307_v36 = vld [vmem:[%s6204_s1 + $0xf0] ss:$28 sps:$4 sm:$0xff]  }
 0x16e   : > { %2760 = vmatpush1.bf16.msra.mxu0 %v5221_v37  ;;  %v5310_v37 = vld [vmem:[%s6204_s1 + $0xa90] ss:$28 sps:$4 sm:$0xff]  }
 0x16f   : > { %2922 = vmatpush1.bf16.msra.mxu1 %v5224_v38  ;;  %2761 = vmatprep.subr.bf16.mxu0 %v5229_v39  ;;  %v5315_v38 = vld [vmem:[%s6204_s1 + $0x12c] ss:$28 sps:$4 sm:$0xff]   ;;  %v5316_v39 = vld [vmem:[%s6204_s1 + $0x1d8] ss:$28 sps:$4 sm:$0xff]  }
 0x170   : > { %2923 = vmatprep.subr.bf16.mxu1 %v5232_v40  ;;  %v6470_v40 = vld [vmem:[#allocation4 + $0x18] ss:$0 sps:$4 sm:$0xff]  }
 0x172   : > { %2762 = vmatpush1.bf16.msra.mxu0 %v5227_v41  ;;  %v5313_v41 = vld [vmem:[%s6204_s1 + $0x128] ss:$28 sps:$4 sm:$0xff]  }
 0x173   : > { %2924 = vmatpush1.bf16.msra.mxu1 %v5230_v42  ;;  %2763 = vmatprep.subr.bf16.mxu0 %v5235_v43  ;;  %v5319_v42 = vld [vmem:[%s6204_s1 + $0x164] ss:$28 sps:$4 sm:$0xff]  }
 0x174   : > { %2925 = vmatprep.subr.bf16.mxu1 %v5238_v44  ;;  %v5317_v43 = vld [vmem:[%s6204_s1 + $0x160] ss:$28 sps:$4 sm:$0xff]   ;;  %v5320_v44 = vld [vmem:[%s6204_s1 + $0x18] ss:$28 sps:$4 sm:$0xff]  }
 0x176   : > { %2764 = vmatpush1.bf16.msra.mxu0 %v5233_v45  ;;  %v5321_v45 = vld [vmem:[%s6204_s1 + $0x210] ss:$28 sps:$4 sm:$0xff]  }
 0x177   : > { %2926 = vmatpush1.bf16.msra.mxu1 %v5236_v46  ;;  %2765 = vmatprep.subr.bf16.mxu0 %v5241_v47  ;;  %v5324_v46 = vld [vmem:[%s6204_s1 + $0x19c] ss:$28 sps:$4 sm:$0xff]  }
 0x178   : > { %2927 = vmatprep.subr.bf16.mxu1 %v5244_v48  ;;  %v5322_v47 = vld [vmem:[%s6204_s1 + $0x198] ss:$28 sps:$4 sm:$0xff]  }
 0x17a   : > { %2766 = vmatpush1.bf16.msra.mxu0 %v5239_v49 }
 0x17b   : > { %2928 = vmatpush1.bf16.msra.mxu1 %v5242_v50  ;;  %2767 = vmatprep.subr.bf16.mxu0 %v5247_v51  ;;  %v5326_v50 = vld [vmem:[%s6204_s1 + $0x248] ss:$28 sps:$4 sm:$0xff]   ;;  %v5329_v51 = vld [vmem:[%s6204_s1 + $0x1d4] ss:$28 sps:$4 sm:$0xff]  }
 0x17c   : > { %2929 = vmatprep.subr.bf16.mxu1 %v5250_v53 }
 0x17e   : > { %2768 = vmatpush1.bf16.msra.mxu0 %v5245_v54 }
 0x17f   : > { %2930 = vmatpush1.bf16.msra.mxu1 %v5248_v55  ;;  %2769 = vmatprep.subr.bf16.mxu0 %v5253_v56  ;;  %v5327_v55 = vld [vmem:[%s6204_s1 + $0x1d0] ss:$28 sps:$4 sm:$0xff]   ;;  %v5330_v56 = vld [vmem:[%s6204_s1 + $0x88] ss:$28 sps:$4 sm:$0xff]  }
 0x180   : > { %2931 = vmatprep.subr.bf16.mxu1 %v5256_v57  ;;  %v5331_v57 = vld [vmem:[%s6204_s1 + $0x280] ss:$28 sps:$4 sm:$0xff]  }
 0x182   : > { %2770 = vmatpush1.bf16.msra.mxu0 %v5251_v58  ;;  %v5334_v58 = vld [vmem:[%s6204_s1 + $0x20c] ss:$28 sps:$4 sm:$0xff]  }
 0x183   : > { %2932 = vmatpush1.bf16.msra.mxu1 %v5254_v59  ;;  %2771 = vmatprep.subr.bf16.mxu0 %v5259_v60  ;;  %v5332_v59 = vld [vmem:[%s6204_s1 + $0x208] ss:$28 sps:$4 sm:$0xff]   ;;  %v5335_v60 = vld [vmem:[%s6204_s1 + $0xc0] ss:$28 sps:$4 sm:$0xff]  }
 0x184   : > { %2933 = vmatprep.subr.bf16.mxu1 %v5262_v61  ;;  %v5336_v61 = vld [vmem:[%s6204_s1 + $0x2b8] ss:$28 sps:$4 sm:$0xff]  }
 0x186   : > { %2772 = vmatpush1.bf16.msra.mxu0 %v5257_v62  ;;  %v5337_v62 = vld [vmem:[%s6204_s1 + $0x240] ss:$28 sps:$4 sm:$0xff]  }
 0x187   : > { %2934 = vmatpush1.bf16.msra.mxu1 %v5260_v63  ;;  %2773 = vmatprep.subr.bf16.mxu0 %v5265_v1  ;;  %v5340_v63 = vld [vmem:[%s6204_s1 + $0xf8] ss:$28 sps:$4 sm:$0xff]   ;;  %v5341_v1 = vld [vmem:[%s6204_s1 + $0x2f0] ss:$28 sps:$4 sm:$0xff]  }
 0x188   : > { %2935 = vmatprep.subr.bf16.mxu1 %v5268_v2  ;;  %v5344_v2 = vld [vmem:[%s6204_s1 + $0x27c] ss:$28 sps:$4 sm:$0xff]  }
 0x18a   : > { %2774 = vmatpush1.bf16.msra.mxu0 %v5263_v3  ;;  %v5342_v3 = vld [vmem:[%s6204_s1 + $0x278] ss:$28 sps:$4 sm:$0xff]  }
 0x18b   : > { %2936 = vmatpush1.bf16.msra.mxu1 %v5266_v4  ;;  %2775 = vmatprep.subr.bf16.mxu0 %v5271_v5  ;;  %v5345_v4 = vld [vmem:[%s6204_s1 + $0x130] ss:$28 sps:$4 sm:$0xff]   ;;  %v5346_v5 = vld [vmem:[%s6204_s1 + $0x328] ss:$28 sps:$4 sm:$0xff]  }
 0x18c   : > { %2937 = vmatprep.subr.bf16.mxu1 %v5274_v6  ;;  %v5349_v6 = vld [vmem:[%s6204_s1 + $0x2b4] ss:$28 sps:$4 sm:$0xff]  }
 0x18e   : > { %2776 = vmatpush1.bf16.msra.mxu0 %v5269_v7  ;;  %v5347_v7 = vld [vmem:[%s6204_s1 + $0x2b0] ss:$28 sps:$4 sm:$0xff]  }
 0x18f   : > { %2938 = vmatpush1.bf16.msra.mxu1 %v5272_v9  ;;  %2777 = vmatprep.subr.bf16.mxu0 %v5277_v10  ;;  %v5350_v9 = vld [vmem:[%s6204_s1 + $0x168] ss:$28 sps:$4 sm:$0xff]   ;;  %v5351_v10 = vld [vmem:[%s6204_s1 + $0x360] ss:$28 sps:$4 sm:$0xff]  }
 0x190   : > { %2939 = vmatprep.subr.bf16.mxu1 %v5280_v11  ;;  %v5354_v11 = vld [vmem:[%s6204_s1 + $0x2ec] ss:$28 sps:$4 sm:$0xff]  }
 0x192   : > { %2778 = vmatpush1.bf16.msra.mxu0 %v5275_v12  ;;  %v5352_v12 = vld [vmem:[%s6204_s1 + $0x2e8] ss:$28 sps:$4 sm:$0xff]  }
 0x193   : > { %2940 = vmatpush1.bf16.msra.mxu1 %v5278_v13  ;;  %2779 = vmatprep.subr.bf16.mxu0 %v5283_v14  ;;  %v5355_v13 = vld [vmem:[%s6204_s1 + $0x1a0] ss:$28 sps:$4 sm:$0xff]   ;;  %v5356_v14 = vld [vmem:[%s6204_s1 + $0x558] ss:$28 sps:$4 sm:$0xff]  }
 0x194   : > { %2941 = vmatprep.subr.bf16.mxu1 %v5286_v16  ;;  %v5359_v16 = vld [vmem:[%s6204_s1 + $0x324] ss:$28 sps:$4 sm:$0xff]  }
 0x196   : > { %2780 = vmatpush1.bf16.msra.mxu0 %v5281_v17  ;;  %v5357_v17 = vld [vmem:[%s6204_s1 + $0x320] ss:$28 sps:$4 sm:$0xff]  }
 0x197   : > { %2942 = vmatpush1.bf16.msra.mxu1 %v5284_v20  ;;  %2995 = vmatprep.subr.bf16.mxu0 %v5294_v22  ;;  %v5360_v20 = vld [vmem:[%s6204_s1 + $0x398] ss:$28 sps:$4 sm:$0xff]  }
 0x198   : > { %2943 = vmatprep.subr.bf16.mxu1 %v5291_v21  ;;  %v5361_v21 = vld [vmem:[%s6204_s1 + $0x590] ss:$28 sps:$4 sm:$0xff]   ;;  %v5364_v22 = vld [vmem:[%s6204_s1 + $0x35c] ss:$28 sps:$4 sm:$0xff]  }
 0x199   : > { %2782 = vmatmul.mubr.bf16.vlgmr.msra.gmra.mrb[0].mxu0 %v6448_v23 }
 0x19a   : > { %2996 = vmatpush1.bf16.msra.mxu0 %v5292_v25  ;;  %3027 = vmatprep.mubr.bf16.mxu0 %v6271_v52  ;;  %v5365_v25 = vld [vmem:[%s6204_s1 + $0x3d0] ss:$28 sps:$4 sm:$0xff]  }
 0x19b   : > { %2944 = vmatpush1.bf16.msra.mxu1 %v5289_v24  ;;  %2997 = vmatprep.subr.bf16.mxu0 %v5297_v26  ;;  %v5362_v24 = vld [vmem:[%s6204_s1 + $0x358] ss:$28 sps:$4 sm:$0xff]   ;;  %v5366_v26 = vld [vmem:[%s6204_s1 + $0x5c8] ss:$28 sps:$4 sm:$0xff]  }
 0x19c   : > { %2954 = vmatprep.subr.bf16.mxu1 %v5303_v27  ;;  %v5369_v27 = vld [vmem:[%s6204_s1 + $0x394] ss:$28 sps:$4 sm:$0xff]  }
 0x19e   : > { %2946 = vmatmul.mubr.bf16.vlgmr.msra.gmra.mrb[4].mxu1 %v6448_v23  ;;  %2998 = vmatpush1.bf16.msra.mxu0 %v5295_v28  ;;  %v5367_v28 = vld [vmem:[%s6204_s1 + $0x390] ss:$28 sps:$4 sm:$0xff]  }
 0x19f   : > { %2955 = vmatpush1.bf16.msra.mxu1 %v5301_v29  ;;  %2999 = vmatprep.subr.bf16.mxu0 %v5300_v18  ;;  %v5370_v29 = vld [vmem:[%s6204_s1 + $0x408] ss:$28 sps:$4 sm:$0xff]   ;;  %v5371_v18 = vld [vmem:[%s6204_s1 + $0x600] ss:$28 sps:$4 sm:$0xff]  }
 0x1a0   : > { %2986 = vmatprep.mubr.bf16.mxu1 %v5849_v0  ;;  %3118 = vmatprep.subr.bf16.mxu1 %v5312_v30  ;;  %v5374_v30 = vld [vmem:[%s6204_s1 + $0x3cc] ss:$28 sps:$4 sm:$0xff]  }
 0x1a2   : > { %3000 = vmatpush1.bf16.msra.mxu0 %v5298_v31  ;;  %v5372_v31 = vld [vmem:[%s6204_s1 + $0x3c8] ss:$28 sps:$4 sm:$0xff]  }
 0x1a3   : > { %3001 = vmatprep.subr.bf16.mxu0 %v5306_v32  ;;  %v5375_v32 = vld [vmem:[%s6204_s1 + $0x440] ss:$28 sps:$4 sm:$0xff]  }
 0x1a6   : > { %3002 = vmatpush1.bf16.msra.mxu0 %v5304_v33  ;;  %v5376_v33 = vld [vmem:[%s6204_s1 + $0x638] ss:$28 sps:$4 sm:$0xff]  }
 0x1a7   : > { %3003 = vmatprep.subr.bf16.mxu0 %v5309_v34  ;;  %v5379_v34 = vld [vmem:[%s6204_s1 + $0x404] ss:$28 sps:$4 sm:$0xff]  }
 0x1aa   : > { %4607 = vmatmul.mubr.msk.bf16.vlgmr.msra.gmra.mrb[4].mxu1 %vm2663_vm0, %v6470_v40  ;;  %3004 = vmatpush1.bf16.msra.mxu0 %v5307_v36  ;;  %v5377_v36 = vld [vmem:[%s6204_s1 + $0x400] ss:$28 sps:$4 sm:$0xff]  }
 0x1ab   : > { %3119 = vmatpush1.bf16.msra.mxu1 %v5310_v37  ;;  %3005 = vmatprep.subr.bf16.mxu0 %v5315_v38  ;;  %v5381_v37 = vld [vmem:[%s6204_s1 + $0x670] ss:$28 sps:$4 sm:$0xff]   ;;  %v5384_v38 = vld [vmem:[%s6204_s1 + $0x43c] ss:$28 sps:$4 sm:$0xff]  }
 0x1ac   : > { %3150 = vmatprep.mubr.bf16.mxu1 %v5849_v0  ;;  %4686 = vmatprep.subr.bf16.mxu1 %v5316_v39  ;;  %v5325_v0 = vld [vmem:[%s6204_s1 + $0x50] ss:$28 sps:$4 sm:$0xff]   ;;  %v5382_v39 = vld [vmem:[%s6204_s1 + $0x438] ss:$28 sps:$4 sm:$0xff]  }
 0x1ae   : > { %3006 = vmatpush1.bf16.msra.mxu0 %v5313_v41  ;;  %v5385_v41 = vld [vmem:[%s6204_s1 + $0x4b0] ss:$28 sps:$4 sm:$0xff]  }
 0x1af   : > { %3007 = vmatprep.subr.bf16.mxu0 %v5319_v42  ;;  %v5389_v42 = vld [vmem:[%s6204_s1 + $0x474] ss:$28 sps:$4 sm:$0xff]  }
 0x1b1   : > { %v6482_v48 = vpop.f32.mrb[0].mxu1 }
 0x1b2   : > { %4608 = vmatmul.mubr.msk.bf16.vlgmr.msra.gmra.mrb[8].mxu1 %vm2663_vm0, %v6470_v40  ;;  %v6487_v49 = vpop.f32.mrb[1].mxu1  ;;  %3008 = vmatpush1.bf16.msra.mxu0 %v5317_v43  ;;  %v5387_v43 = vld [vmem:[%s6204_s1 + $0x470] ss:$28 sps:$4 sm:$0xff]  }
 0x1b3   : > { %4687 = vmatpush3.bf16.msra.mxu1 %v5320_v44  ;;  %v2828_v53 = vpop.f32.mrb[2].mxu1  ;;  %3009 = vmatprep.subr.bf16.mxu0 %v5324_v46  ;;  %v5390_v44 = vld [vmem:[%s6204_s1 + $0x4e8] ss:$28 sps:$4 sm:$0xff]  }
 0x1b4   : > { %4688 = vmatprep.subr.bf16.mxu1 %v5321_v45  ;;  %v2829_v54 = vpop.f32.mrb[3].mxu1  ;;  %3191 = vmatprep.mubr.bf16.mxu1 %v6271_v52  ;;  %v5339_v52 = vld [vmem:[%s6204_s1 + $0x244] ss:$28 sps:$4 sm:$0xff]   ;;  %v5394_v46 = vld [vmem:[%s6204_s1 + $0x4ac] ss:$28 sps:$4 sm:$0xff]  }
 0x1b5   : > { %v5391_v45 = vld [vmem:[%s6204_s1 + $0x6e0] ss:$28 sps:$4 sm:$0xff]   ;;  %v5400_v54 = vld [vmem:[%s6204_s1 + $0x718] ss:$28 sps:$4 sm:$0xff]  }
 0x1b6   : > { %3010 = vmatpush1.bf16.msra.mxu0 %v5322_v47  ;;  %v5392_v47 = vld [vmem:[%s6204_s1 + $0x4a8] ss:$28 sps:$4 sm:$0xff]   ;;  %v5397_v53 = vld [vmem:[%s6204_s1 + $0x4e0] ss:$28 sps:$4 sm:$0xff]  }
 0x1b7   : > { %4689 = vmatpush3.bf16.msra.mxu1 %v5325_v0  ;;  %3011 = vmatprep.subr.bf16.mxu0 %v5329_v51  ;;  %v5395_v0 = vld [vmem:[%s6204_s1 + $0x520] ss:$28 sps:$4 sm:$0xff]  }
 0x1b8   : > { %4690 = vmatprep.subr.bf16.mxu1 %v5326_v50  ;;  %v5396_v50 = vld [vmem:[%s6204_s1 + $0x8d8] ss:$28 sps:$4 sm:$0xff]   ;;  %v5399_v51 = vld [vmem:[%s6204_s1 + $0x4e4] ss:$28 sps:$4 sm:$0xff]  }
 0x1ba   : > { %3012 = vmatpush1.bf16.msra.mxu0 %v5327_v55  ;;  %v5401_v55 = vld [vmem:[%s6204_s1 + $0x910] ss:$28 sps:$4 sm:$0xff]  }
 0x1bb   : > { %4691 = vmatpush3.bf16.msra.mxu1 %v5330_v56  ;;  %3013 = vmatprep.subr.bf16.mxu0 %v5334_v58  ;;  %v5404_v56 = vld [vmem:[%s6204_s1 + $0x51c] ss:$28 sps:$4 sm:$0xff]   ;;  %v5405_v58 = vld [vmem:[%s6204_s1 + $0x750] ss:$28 sps:$4 sm:$0xff]  }
 0x1bc   : > { %4692 = vmatprep.subr.bf16.mxu1 %v5331_v57  ;;  %v5402_v57 = vld [vmem:[%s6204_s1 + $0x518] ss:$28 sps:$4 sm:$0xff]  }
 0x1be   : > { %3014 = vmatpush1.bf16.msra.mxu0 %v5332_v59  ;;  %v5406_v59 = vld [vmem:[%s6204_s1 + $0x948] ss:$28 sps:$4 sm:$0xff]  }
 0x1bf   : > { %4693 = vmatpush3.bf16.msra.mxu1 %v5335_v60  ;;  %3015 = vmatprep.subr.bf16.mxu0 %v5339_v52  ;;  %v5409_v60 = vld [vmem:[%s6204_s1 + $0x554] ss:$28 sps:$4 sm:$0xff]   ;;  %v5410_v52 = vld [vmem:[%s6204_s1 + $0x788] ss:$28 sps:$4 sm:$0xff]  }
 0x1c0   : > { %4694 = vmatprep.subr.bf16.mxu1 %v5336_v61  ;;  %v5407_v61 = vld [vmem:[%s6204_s1 + $0x550] ss:$28 sps:$4 sm:$0xff]  }
 0x1c2   : > { %3016 = vmatpush1.bf16.msra.mxu0 %v5337_v62  ;;  %v5411_v62 = vld [vmem:[%s6204_s1 + $0x980] ss:$28 sps:$4 sm:$0xff]  }
 0x1c3   : > { %4695 = vmatpush3.bf16.msra.mxu1 %v5340_v63  ;;  %3017 = vmatprep.subr.bf16.mxu0 %v5344_v2  ;;  %v5414_v63 = vld [vmem:[%s6204_s1 + $0x58c] ss:$28 sps:$4 sm:$0xff]   ;;  %v5415_v2 = vld [vmem:[%s6204_s1 + $0x7c0] ss:$28 sps:$4 sm:$0xff]  }
 0x1c4   : > { %4696 = vmatprep.subr.bf16.mxu1 %v5341_v1  ;;  %v5412_v1 = vld [vmem:[%s6204_s1 + $0x588] ss:$28 sps:$4 sm:$0xff]  }
 0x1c6   : > { %3018 = vmatpush1.bf16.msra.mxu0 %v5342_v3  ;;  %v5416_v3 = vld [vmem:[%s6204_s1 + $0x9b8] ss:$28 sps:$4 sm:$0xff]  }
 0x1c7   : > { %4697 = vmatpush3.bf16.msra.mxu1 %v5345_v4  ;;  %3019 = vmatprep.subr.bf16.mxu0 %v5349_v6  ;;  %v5419_v4 = vld [vmem:[%s6204_s1 + $0x5c4] ss:$28 sps:$4 sm:$0xff]   ;;  %v5420_v6 = vld [vmem:[%s6204_s1 + $0x7f8] ss:$28 sps:$4 sm:$0xff]  }
 0x1c8   : > { %4698 = vmatprep.subr.bf16.mxu1 %v5346_v5  ;;  %v5417_v5 = vld [vmem:[%s6204_s1 + $0x5c0] ss:$28 sps:$4 sm:$0xff]  }
 0x1ca   : > { %3020 = vmatpush1.bf16.msra.mxu0 %v5347_v7  ;;  %v5421_v7 = vld [vmem:[%s6204_s1 + $0x9f0] ss:$28 sps:$4 sm:$0xff]  }
 0x1cb   : > { %4699 = vmatpush3.bf16.msra.mxu1 %v5350_v9  ;;  %3021 = vmatprep.subr.bf16.mxu0 %v5354_v11  ;;  %v5424_v9 = vld [vmem:[%s6204_s1 + $0x5fc] ss:$28 sps:$4 sm:$0xff]   ;;  %v5425_v11 = vld [vmem:[%s6204_s1 + $0x830] ss:$28 sps:$4 sm:$0xff]  }
 0x1cc   : > { %4700 = vmatprep.subr.bf16.mxu1 %v5351_v10  ;;  %v5422_v10 = vld [vmem:[%s6204_s1 + $0x5f8] ss:$28 sps:$4 sm:$0xff]  }
 0x1ce   : > { %3022 = vmatpush1.bf16.msra.mxu0 %v5352_v12  ;;  %v5426_v12 = vld [vmem:[%s6204_s1 + $0xa28] ss:$28 sps:$4 sm:$0xff]  }
 0x1cf   : > { %4701 = vmatpush3.bf16.msra.mxu1 %v5355_v13  ;;  %3023 = vmatprep.subr.bf16.mxu0 %v5359_v16  ;;  %v5429_v13 = vld [vmem:[%s6204_s1 + $0x634] ss:$28 sps:$4 sm:$0xff]   ;;  %v5430_v16 = vld [vmem:[%s6204_s1 + $0x868] ss:$28 sps:$4 sm:$0xff]  }
 0x1d0   : > { %4708 = vmatprep.subr.bf16.mxu1 %v5356_v14  ;;  %v5427_v14 = vld [vmem:[%s6204_s1 + $0x630] ss:$28 sps:$4 sm:$0xff]  }
 0x1d2   : > { %3192 = vmatmul.mubr.bf16.vlgmr.msra.gmra.mrb[12].mxu1 %v6293_v8  ;;  %3024 = vmatpush1.bf16.msra.mxu0 %v5357_v17  ;;  %v5431_v17 = vld [vmem:[%s6204_s1 + $0xa60] ss:$28 sps:$4 sm:$0xff]  }
 0x1d3   : > { %4709 = vmatpush3.bf16.msra.mxu1 %v5360_v20  ;;  %3025 = vmatprep.subr.bf16.mxu0 %v5364_v22  ;;  %v5434_v20 = vld [vmem:[%s6204_s1 + $0x66c] ss:$28 sps:$4 sm:$0xff]   ;;  %v5435_v22 = vld [vmem:[%s6204_s1 + $0x8a0] ss:$28 sps:$4 sm:$0xff]  }
 0x1d4   : > { %4710 = vmatprep.subr.bf16.mxu1 %v5361_v21  ;;  %3231 = vmatprep.mubr.bf16.mxu1 %v6326_v35  ;;  %v5432_v21 = vld [vmem:[%s6204_s1 + $0x668] ss:$28 sps:$4 sm:$0xff]  }
 0x1d6   : > { %3026 = vmatpush1.bf16.msra.mxu0 %v5362_v24  ;;  %v5438_v24 = vld [vmem:[%s6204_s1 + $0x6a4] ss:$28 sps:$4 sm:$0xff]  }
 0x1d7   : > { %4711 = vmatpush3.bf16.msra.mxu1 %v5365_v25  ;;  %3036 = vmatprep.subr.bf16.mxu0 %v5369_v27  ;;  %v5436_v25 = vld [vmem:[%s6204_s1 + $0x6a0] ss:$28 sps:$4 sm:$0xff]   ;;  %v5850_v27 = vmov 0.0  }
 0x1d8   : > { %4712 = vmatprep.subr.bf16.mxu1 %v5366_v26  ;;  %v5442_v26 = vld [vmem:[%s6204_s1 + $0xa98] ss:$28 sps:$4 sm:$0xff]  }
 0x1d9   : > { %3028 = vmatmul.mubr.bf16.vlgmr.msra.gmra.mrb[4].mxu0 %v6293_v8  ;;  %v5380_v8 = vld [vmem:[%s6204_s1 + $0x478] ss:$28 sps:$4 sm:$0xff]  }
 0x1da   : > { %3037 = vmatpush1.bf16.msra.mxu0 %v5367_v28  ;;  %3068 = vmatprep.mubr.bf16.mxu0 %v6326_v35  ;;  %v5386_v35 = vld [vmem:[%s6204_s1 + $0x6a8] ss:$28 sps:$4 sm:$0xff]   ;;  %v5441_v28 = vld [vmem:[%s6204_s1 + $0x6dc] ss:$28 sps:$4 sm:$0xff]  }
 0x1db   : > { %4713 = vmatpush3.bf16.msra.mxu1 %v5370_v29  ;;  %3038 = vmatprep.subr.bf16.mxu0 %v5374_v30  ;;  %v5439_v29 = vld [vmem:[%s6204_s1 + $0x6d8] ss:$28 sps:$4 sm:$0xff]   ;;  %v5443_v30 = vld [vmem:[%s6204_s1 + $0x710] ss:$28 sps:$4 sm:$0xff]  }
 0x1dc   : > { %4714 = vmatprep.subr.bf16.mxu1 %v5371_v18  ;;  %v5445_v18 = vld [vmem:[%s6204_s1 + $0x714] ss:$28 sps:$4 sm:$0xff]  }
 0x1de   : > { %3039 = vmatpush1.bf16.msra.mxu0 %v5372_v31  ;;  %v5448_v31 = vld [vmem:[%s6204_s1 + $0x74c] ss:$28 sps:$4 sm:$0xff]  }
 0x1df   : > { %4715 = vmatpush3.bf16.msra.mxu1 %v5375_v32  ;;  %3040 = vmatprep.subr.bf16.mxu0 %v5379_v34  ;;  %v5446_v32 = vld [vmem:[%s6204_s1 + $0x748] ss:$28 sps:$4 sm:$0xff]   ;;  %v5449_v34 = vld [vmem:[%s6204_s1 + $0x780] ss:$28 sps:$4 sm:$0xff]  }
 0x1e0   : > { %4716 = vmatprep.subr.bf16.mxu1 %v5376_v33  ;;  %v5451_v33 = vld [vmem:[%s6204_s1 + $0x784] ss:$28 sps:$4 sm:$0xff]  }
 0x1e2   : > { %3041 = vmatpush1.bf16.msra.mxu0 %v5377_v36  ;;  %v5454_v36 = vld [vmem:[%s6204_s1 + $0x7bc] ss:$28 sps:$4 sm:$0xff]  }
 0x1e3   : > { %4717 = vmatpush3.bf16.msra.mxu1 %v5380_v8  ;;  %3042 = vmatprep.subr.bf16.mxu0 %v5384_v38  ;;  %v5455_v8 = vld [vmem:[%s6204_s1 + $0x7f0] ss:$28 sps:$4 sm:$0xff]   ;;  %v5463_v38 = vld [vmem:[%s6204_s1 + $0x864] ss:$28 sps:$4 sm:$0xff]  }
 0x1e4   : > { %4718 = vmatprep.subr.bf16.mxu1 %v5381_v37  ;;  %v5458_v37 = vld [vmem:[%s6204_s1 + $0x828] ss:$28 sps:$4 sm:$0xff]  }
 0x1e6   : > { %3043 = vmatpush1.bf16.msra.mxu0 %v5382_v39  ;;  %v5461_v39 = vld [vmem:[%s6204_s1 + $0x860] ss:$28 sps:$4 sm:$0xff]  }
 0x1e7   : > { %4719 = vmatpush3.bf16.msra.mxu1 %v5385_v41  ;;  %3044 = vmatprep.subr.bf16.mxu0 %v5389_v42  ;;  %v5466_v41 = vld [vmem:[%s6204_s1 + $0x89c] ss:$28 sps:$4 sm:$0xff]   ;;  %v5469_v42 = vld [vmem:[%s6204_s1 + $0x8d4] ss:$28 sps:$4 sm:$0xff]  }
 0x1e8   : > { %4720 = vmatprep.subr.bf16.mxu1 %v5386_v35  ;;  %v5464_v35 = vld [vmem:[%s6204_s1 + $0x898] ss:$28 sps:$4 sm:$0xff]  }
 0x1ea   : > { %3045 = vmatpush1.bf16.msra.mxu0 %v5387_v43  ;;  %v5467_v43 = vld [vmem:[%s6204_s1 + $0x8d0] ss:$28 sps:$4 sm:$0xff]  }
 0x1eb   : > { %4721 = vmatpush3.bf16.msra.mxu1 %v5390_v44  ;;  %3046 = vmatprep.subr.bf16.mxu0 %v5394_v46  ;;  %v5472_v44 = vld [vmem:[%s6204_s1 + $0x90c] ss:$28 sps:$4 sm:$0xff]   ;;  %v5475_v46 = vld [vmem:[%s6204_s1 + $0x944] ss:$28 sps:$4 sm:$0xff]  }
 0x1ec   : > { %4722 = vmatprep.subr.bf16.mxu1 %v5391_v45  ;;  %v5470_v45 = vld [vmem:[%s6204_s1 + $0x908] ss:$28 sps:$4 sm:$0xff]  }
 0x1ee   : > { %3047 = vmatpush1.bf16.msra.mxu0 %v5392_v47  ;;  %v5473_v47 = vld [vmem:[%s6204_s1 + $0x940] ss:$28 sps:$4 sm:$0xff]  }
 0x1ef   : > { %4723 = vmatpush3.bf16.msra.mxu1 %v5395_v0  ;;  %3048 = vmatprep.subr.bf16.mxu0 %v5399_v51  ;;  %v5478_v0 = vld [vmem:[%s6204_s1 + $0x97c] ss:$28 sps:$4 sm:$0xff]   ;;  %v5481_v51 = vld [vmem:[%s6204_s1 + $0x9b4] ss:$28 sps:$4 sm:$0xff]  }
 0x1f0   : > { %4730 = vmatprep.subr.bf16.mxu1 %v5396_v50  ;;  %v5476_v50 = vld [vmem:[%s6204_s1 + $0x978] ss:$28 sps:$4 sm:$0xff]  }
 0x1f2   : > { %3232 = vmatmul.mubr.bf16.vlgmr.msra.gmra.mrb[16].mxu1 %v6372_v15  ;;  %3049 = vmatpush1.bf16.msra.mxu0 %v5397_v53  ;;  %v5479_v53 = vld [vmem:[%s6204_s1 + $0x9b0] ss:$28 sps:$4 sm:$0xff]  }
 0x1f3   : > { %4731 = vmatpush3.bf16.msra.mxu1 %v5400_v54  ;;  %3050 = vmatprep.subr.bf16.mxu0 %v5404_v56  ;;  %v5484_v54 = vld [vmem:[%s6204_s1 + $0x9ec] ss:$28 sps:$4 sm:$0xff]   ;;  %v5487_v56 = vld [vmem:[%s6204_s1 + $0xa24] ss:$28 sps:$4 sm:$0xff]  }
 0x1f4   : > { %4732 = vmatprep.subr.bf16.mxu1 %v5401_v55  ;;  %3271 = vmatprep.mubr.bf16.mxu1 %v6380_v19  ;;  %v5482_v55 = vld [vmem:[%s6204_s1 + $0x9e8] ss:$28 sps:$4 sm:$0xff]  }
 0x1f6   : > { %3051 = vmatpush1.bf16.msra.mxu0 %v5402_v57  ;;  %v5485_v57 = vld [vmem:[%s6204_s1 + $0xa20] ss:$28 sps:$4 sm:$0xff]  }
 0x1f7   : > { %4733 = vmatpush3.bf16.msra.mxu1 %v5405_v58  ;;  %3052 = vmatprep.subr.bf16.mxu0 %v5409_v60  ;;  %v5490_v58 = vld [vmem:[%s6204_s1 + $0xa5c] ss:$28 sps:$4 sm:$0xff]   ;;  %v3319_v60 = vld [vmem:[%s6196_s24] sm:$0xff] }
 0x1f8   : > { %4734 = vmatprep.subr.bf16.mxu1 %v5406_v59  ;;  %v5488_v59 = vld [vmem:[%s6204_s1 + $0xa58] ss:$28 sps:$4 sm:$0xff]  }
 0x1fa   : > { %3053 = vmatpush1.bf16.msra.mxu0 %v5407_v61  ;;  %v3320_v61 = vld [vmem:[%s6196_s24 + $0x8] sm:$0xff] }
 0x1fb   : > { %4735 = vmatpush3.bf16.msra.mxu1 %v5410_v52  ;;  %3054 = vmatprep.subr.bf16.mxu0 %v5414_v63  ;;  %v3326_v63 = vmul.f32 0.9, %v3319_v60 }
 0x1fc   : > { %4736 = vmatprep.subr.bf16.mxu1 %v5411_v62 }
 0x1fe   : > { %3055 = vmatpush1.bf16.msra.mxu0 %v5412_v1 }
 0x1ff   : > { %4737 = vmatpush3.bf16.msra.mxu1 %v5415_v2  ;;  %3056 = vmatprep.subr.bf16.mxu0 %v5419_v4 }
 0x200   : > { %4738 = vmatprep.subr.bf16.mxu1 %v5416_v3  ;;  %v3327_v3 = vmul.f32 0.9, %v3320_v61 }
 0x202   : > { %3057 = vmatpush1.bf16.msra.mxu0 %v5417_v5 }
 0x203   : > { %4739 = vmatpush3.bf16.msra.mxu1 %v5420_v6  ;;  %3058 = vmatprep.subr.bf16.mxu0 %v5424_v9 }
 0x204   : > { %4740 = vmatprep.subr.bf16.mxu1 %v5421_v7 }
 0x206   : > { %3059 = vmatpush1.bf16.msra.mxu0 %v5422_v10 }
 0x207   : > { %4741 = vmatpush3.bf16.msra.mxu1 %v5425_v11  ;;  %3060 = vmatprep.subr.bf16.mxu0 %v5429_v13  ;;  %v3322_v13 = vld [vmem:[%s6196_s24 + $0x18] sm:$0xff] }
 0x208   : > { %4742 = vmatprep.subr.bf16.mxu1 %v5426_v12  ;;  %v3321_v12 = vld [vmem:[%s6196_s24 + $0x10] sm:$0xff] }
 0x20a   : > { %3061 = vmatpush1.bf16.msra.mxu0 %v5427_v14  ;;  %v3328_v14 = vmul.f32 0.9, %v3321_v12 }
 0x20b   : > { %4743 = vmatpush3.bf16.msra.mxu1 %v5430_v16  ;;  %3062 = vmatprep.subr.bf16.mxu0 %v5434_v20 }
 0x20c   : > { %4744 = vmatprep.subr.bf16.mxu1 %v5431_v17  ;;  %v3329_v17 = vmul.f32 0.9, %v3322_v13 }
 0x20e   : > { %3063 = vmatpush1.bf16.msra.mxu0 %v5432_v21 }
 0x20f   : > { %4745 = vmatpush3.bf16.msra.mxu1 %v5435_v22  ;;  %3064 = vmatprep.subr.bf16.mxu0 %v5438_v24 }
 0x210   : > { %4829 = vmatprep.subr.bf16.mxu1 %v5850_v27 }
 0x212   : > { %3272 = vmatmul.mubr.bf16.vlgmr.msra.gmra.mrb[20].mxu1 %v6448_v23  ;;  %3065 = vmatpush1.bf16.msra.mxu0 %v5436_v25 }
 0x213   : > { %4830 = vmatpush3.bf16.msra.mxu1 %v5442_v26  ;;  %3066 = vmatprep.subr.bf16.mxu0 %v5441_v28 }
 0x214   : > { %4831 = vmatprep.mubr.msk.bf16.mxu1 %vm5851_vm1, %v5850_v27 }
 0x216   : > { %3067 = vmatpush1.bf16.msra.mxu0 %v5439_v29 }
 0x217   : > { %3077 = vmatprep.subr.bf16.mxu0 %v5445_v18 }
 0x219   : > { %3069 = vmatmul.mubr.bf16.vlgmr.msra.gmra.mrb[4].mxu0 %v6372_v15  ;;  %v5457_v15 = vld [vmem:[%s6204_s1 + $0x7f4] ss:$28 sps:$4 sm:$0xff]  }
 0x21a   : > { %4832 = vmatmul.mubr.msk.bf16.vlgmr.msra.gmra.mrb[24].mxu1 %vm2663_vm0, %v6470_v40  ;;  %3078 = vmatpush1.bf16.msra.mxu0 %v5443_v30  ;;  %v5452_v40 = vld [vmem:[%s6204_s1 + $0x7b8] ss:$28 sps:$4 sm:$0xff]  }
 0x21b   : > { %3109 = vmatprep.mubr.bf16.mxu0 %v6380_v19  ;;  %3079 = vmatprep.subr.bf16.mxu0 %v5448_v31  ;;  %v5460_v19 = vld [vmem:[%s6204_s1 + $0x82c] ss:$28 sps:$4 sm:$0xff]  }
 0x21e   : > { %3080 = vmatpush1.bf16.msra.mxu0 %v5446_v32 }
 0x21f   : > { %3081 = vmatprep.subr.bf16.mxu0 %v5451_v33 }
 0x222   : > { %3082 = vmatpush1.bf16.msra.mxu0 %v5449_v34 }
 0x223   : > { %3083 = vmatprep.subr.bf16.mxu0 %v5454_v36 }
 0x226   : > { %3084 = vmatpush1.bf16.msra.mxu0 %v5452_v40 }
 0x227   : > { %3085 = vmatprep.subr.bf16.mxu0 %v5457_v15 }
 0x22a   : > { %3086 = vmatpush1.bf16.msra.mxu0 %v5455_v8 }
 0x22b   : > { %3087 = vmatprep.subr.bf16.mxu0 %v5460_v19 }
 0x22e   : > { %3088 = vmatpush1.bf16.msra.mxu0 %v5458_v37 }
 0x22f   : > { %3089 = vmatprep.subr.bf16.mxu0 %v5463_v38 }
 0x232   : > { %3090 = vmatpush1.bf16.msra.mxu0 %v5461_v39 }
 0x233   : > { %3091 = vmatprep.subr.bf16.mxu0 %v5466_v41 }
 0x236   : > { %3092 = vmatpush1.bf16.msra.mxu0 %v5464_v35 }
 0x237   : > { %3093 = vmatprep.subr.bf16.mxu0 %v5469_v42 }
 0x23a   : > { %3094 = vmatpush1.bf16.msra.mxu0 %v5467_v43 }
 0x23b   : > { %3095 = vmatprep.subr.bf16.mxu0 %v5472_v44 }
 0x23e   : > { %3096 = vmatpush1.bf16.msra.mxu0 %v5470_v45 }
 0x23f   : > { %3097 = vmatprep.subr.bf16.mxu0 %v5475_v46 }
 0x242   : > { %3098 = vmatpush1.bf16.msra.mxu0 %v5473_v47 }
 0x243   : > { %3099 = vmatprep.subr.bf16.mxu0 %v5478_v0 }
 0x246   : > { %3100 = vmatpush1.bf16.msra.mxu0 %v5476_v50 }
 0x247   : > { %3101 = vmatprep.subr.bf16.mxu0 %v5481_v51  ;;  %v3325_v51 = vld [vmem:[%s6196_s24 + $0x30] sm:$0xff] }
 0x24a   : > { %3102 = vmatpush1.bf16.msra.mxu0 %v5479_v53 }
 0x24b   : > { %3103 = vmatprep.subr.bf16.mxu0 %v5484_v54 }
 0x24e   : > { %3104 = vmatpush1.bf16.msra.mxu0 %v5482_v55  ;;  %v3332_v55 = vmul.f32 0.9, %v3325_v51 }
 0x24f   : > { %3105 = vmatprep.subr.bf16.mxu0 %v5487_v56 }
 0x252   : > { %3106 = vmatpush1.bf16.msra.mxu0 %v5485_v57 }
 0x253   : > { %3107 = vmatprep.subr.bf16.mxu0 %v5490_v58 }
 0x256   : > { %3108 = vmatpush1.bf16.msra.mxu0 %v5488_v59 }
 0x259   : > { %3110 = vmatmul.mubr.bf16.vlgmr.msra.gmra.mrb[4].mxu0 %v6448_v23 }
 0x26c   : > { %v2783_v52 = vpop.f32.mrb[0].mxu0 }
 0x26d   : > { %v4855_v62 = vadd.f32 %v6482_v48, %v2783_v52  ;;  %v2785_v1 = vpop.f32.mrb[1].mxu0 }
 0x26e   : > { %v4856_v2 = vadd.f32 %v6487_v49, %v2785_v1  ;;  %v2787_v4 = vpop.f32.mrb[2].mxu0 }
 0x26f   : > { %v3333_v5 = vmul.f32 0.1, %v4855_v62  ;;  %v2788_v6 = vpop.f32.mrb[3].mxu0  ;;  %v3323_v62 = vld [vmem:[%s6196_s24 + $0x20] sm:$0xff] }
 0x270   : > { %v3334_v7 = vmul.f32 0.1, %v4856_v2 }
 0x271   : > { %v3340_v9 = vadd.f32 %v3333_v5, %v3326_v63  ;;  %v3324_v63 = vld [vmem:[%s6196_s24 + $0x28] sm:$0xff] }
 0x272   : > { %v3341_v23 = vadd.f32 %v3334_v7, %v3327_v3  ;;  %v3330_v3 = vmul.f32 0.9, %v3323_v62  ;;  %v3331_v6 = vmul.f32 0.9, %v3324_v63 }
 0x273   : > { %v4610_v10 = vadd.f32 -0.05, %v3340_v9  ;;  %3361 = vst [vmem:[%s6635_s16] sm:$0xff] %v3340_v9 }
 0x274   : > { %v4611_v48 = vadd.f32 -0.05, %v3341_v23  ;;  %3362 = vst [vmem:[%s6635_s16 + $0x8] sm:$0xff] %v3341_v23 }
 0x275   : > { %v6639_v11 = vmax.f32 %v4610_v10, 0.0 }
 0x276   : > { %v6641_v49 = vmax.f32 %v4611_v48, 0.0 }
 0x277   : > { %3368 = vst [vmem:[%s6644_s15] sm:$0xff] %v6639_v11 }
 0x278   : > { %3369 = vst [vmem:[%s6644_s15 + $0x8] sm:$0xff] %v6641_v49 }
 0x27d   : > { %v2988_v16 = vpop.f32.mrb[4].mxu1 }
 0x27e   : > { %v3335_v20 = vmul.f32 0.1, %v2988_v16  ;;  %v2990_v21 = vpop.f32.mrb[5].mxu1 }
 0x27f   : > { %v3336_v22 = vmul.f32 0.1, %v2990_v21  ;;  %v2992_v24 = vpop.f32.mrb[6].mxu1 }
 0x280   : > { %v3342_v25 = vadd.f32 %v3335_v20, %v3328_v14  ;;  %v2993_v26 = vpop.f32.mrb[7].mxu1  ;;  %v5852_v20 = vmov (!%p6901_p1), 0.0  }
 0x281   : > { %v3343_v28 = vadd.f32 %v3336_v22, %v3329_v17  ;;  %3379 = vst [vmem:[#allocation2] sm:$0xff] (!%p6901_p1), %v5852_v20 }
 0x282   : > { %v4612_v29 = vadd.f32 -0.05, %v3342_v25  ;;  %3363 = vst [vmem:[%s6635_s16 + $0x10] sm:$0xff] %v3342_v25 }
 0x283   : > { %v4613_v18 = vadd.f32 -0.05, %v3343_v28  ;;  %3364 = vst [vmem:[%s6635_s16 + $0x18] sm:$0xff] %v3343_v28 }
 0x284   : > { %v6654_v30 = vmax.f32 %v4612_v29, 0.0 }
 0x285   : > { %v6656_v31 = vmax.f32 %v4613_v18, 0.0  ;;  %v3152_v32 = vpop.f32.mrb[8].mxu1 }
 0x286   : > { %3370 = vst [vmem:[%s6644_s15 + $0x10] sm:$0xff] %v6654_v30  ;;  %v3154_v33 = vpop.f32.mrb[9].mxu1 }
 0x287   : > { %3371 = vst [vmem:[%s6644_s15 + $0x18] sm:$0xff] %v6656_v31  ;;  %v3156_v34 = vpop.f32.mrb[10].mxu1 }
 0x288   : > { %v3157_v36 = vpop.f32.mrb[11].mxu1 }
 0x2a5   : > { %v4702_v40 = vpop.f32.mrb[12].mxu1 }
 0x2a6   : > { %v4703_v15 = vpop.f32.mrb[13].mxu1 }
 0x2a7   : > { %v4704_v8 = vadd.f32 %v4703_v15, %v4702_v40  ;;  %v4705_v19 = vpop.f32.mrb[14].mxu1 }
 0x2a8   : > { %v4706_v37 = vpop.f32.mrb[15].mxu1 }
 0x2c5   : > { %v4724_v38 = vpop.f32.mrb[16].mxu1 }
 0x2c6   : > { %v4725_v39 = vpop.f32.mrb[17].mxu1 }
 0x2c7   : > { %v4726_v41 = vadd.f32 %v4725_v39, %v4724_v38  ;;  %v4727_v35 = vpop.f32.mrb[18].mxu1 }
 0x2c8   : > { %v4728_v42 = vpop.f32.mrb[19].mxu1 }
 0x2c9   : > { %v3234_v43 = vadd.f32 %v4726_v41, %v4704_v8 }
 0x2e5   : > { %v4746_v44 = vpop.f32.mrb[20].mxu1 }
 0x2e6   : > { %v4747_v45 = vpop.f32.mrb[21].mxu1 }
 0x2e7   : > { %v4748_v46 = vadd.f32 %v4747_v45, %v4746_v44  ;;  %v4749_v47 = vpop.f32.mrb[22].mxu1 }
 0x2e8   : > { %v4750_v0 = vpop.f32.mrb[23].mxu1 }
 0x2e9   : > { %v3274_v50 = vadd.f32 %v4748_v46, %v3234_v43 }
 0x2ed   : > { %v3313_v53 = vpop.f32.mrb[24].mxu1 }
 0x2ee   : > { %v3314_v54 = vadd.f32 %v3313_v53, %v3274_v50  ;;  %v4833_v56 = vpop.f32.mrb[25].mxu1 }
 0x2ef   : > { %v3316_v57 = vpop.f32.mrb[26].mxu1 }
 0x2f0   : > { %v3339_v58 = vmul.f32 0.1, %v3314_v54  ;;  %v4834_v59 = vpop.f32.mrb[27].mxu1 }
 0x2f2   : > { %v3346_v60 = vadd.f32 %v3339_v58, %v3332_v55 }
 0x2f4   : > { %v4616_v61 = vadd.f32 -0.05, %v3346_v60  ;;  %3367 = vst [vmem:[%s6635_s16 + $0x30] sm:$0xff] %v3346_v60 }
 0x2f6   : > { %v6664_v52 = vmax.f32 %v4616_v61, 0.0 }
 0x2f8   : > { %3374 = vst [vmem:[%s6644_s15 + $0x30] sm:$0xff] %v6664_v52 }
 0x32c   : > { %v3111_v1 = vpop.f32.mrb[4].mxu0 }
 0x32d   : > { %v4857_v2 = vadd.f32 %v3152_v32, %v3111_v1  ;;  %v3113_v4 = vpop.f32.mrb[5].mxu0 }
 0x32e   : > { %v4858_v5 = vadd.f32 %v3154_v33, %v3113_v4  ;;  %v3115_v7 = vpop.f32.mrb[6].mxu0 }
 0x32f   : > { %v3337_v9 = vmul.f32 0.1, %v4857_v2  ;;  %v3116_v23 = vpop.f32.mrb[7].mxu0 }
 0x330   : > { %v3338_v10 = vmul.f32 0.1, %v4858_v5 }
 0x331   : > { %v3344_v48 = vadd.f32 %v3337_v9, %v3330_v3 }
 0x332   : > { %v3345_v12 = vadd.f32 %v3338_v10, %v3331_v6  ;;  %3378 = sbr.rel (%p6901_p1) target bundleno = 825 (0x339), region = 76 }
 0x333   : > { %v4614_v13 = vadd.f32 -0.05, %v3344_v48  ;;  %3365 = vst [vmem:[%s6635_s16 + $0x20] sm:$0xff] %v3344_v48 }
 0x334   : > { %v4615_v14 = vadd.f32 -0.05, %v3345_v12  ;;  %3366 = vst [vmem:[%s6635_s16 + $0x28] sm:$0xff] %v3345_v12 }
 0x335   : > { %v6672_v16 = vmax.f32 %v4614_v13, 0.0 }
 0x336   : > { %v6674_v17 = vmax.f32 %v4615_v14, 0.0 }
 0x337   : > { %3372 = vst [vmem:[%s6644_s15 + $0x20] sm:$0xff] %v6672_v16 }
 0x338   : > { %3373 = vst [vmem:[%s6644_s15 + $0x28] sm:$0xff] %v6674_v17 }
 0x339 PF: > { %v5492_v21 = vld [vmem:[%s6206_s19 + $0x40] sm:$0xff]   ;;  %v3382_v22 = vpack.c.bf16 %v6641_v49, %v6641_v49  ;;  %4835 = vmatprep.subr.bf16.mxu0 %v5850_v27  ;;  %4851 = vmatprep.mubr.msk.bf16.mxu0 %vm5851_vm1, %v5850_v27  ;;  %v5494_v25 = vld [vmem:[%s6206_s19 + $0x48] sm:$0xff]   ;;  %v5496_v28 = vld [vmem:[%s6206_s19 + $0x50] sm:$0xff]   ;;  %v3381_v38 = vpack.c.bf16 %v6639_v11, %v6639_v11  ;;  %v3384_v41 = vpack.c.bf16 %v6656_v31, %v6656_v31  ;;  %p4674_p11 = scmp.ne.s32.totalorder %s5929_s6, 7 }
 0x33a   : > { %v5493_v24 = vld [vmem:[%s6206_s19] sm:$0xff]   ;;  %4754 = vmatprep.subr.bf16.mxu1 %v5492_v21  ;;  %v5495_v26 = vld [vmem:[%s6206_s19 + $0x8] sm:$0xff]   ;;  %v5497_v49 = vld [vmem:[%s6206_s19 + $0x10] sm:$0xff]   ;;  %v3383_v1 = vpack.c.bf16 %v6654_v30, %v6654_v30  ;;  %v3386_v3 = vpack.c.bf16 %v6674_v17, %v6674_v17  ;;  %v3387_v5 = vpack.c.bf16 %v6664_v52, %v6664_v52  ;;  %v3385_v20 = vpack.c.bf16 %v6672_v16, %v6672_v16  ;;  %s4022_s17 = sld [smem:[#allocation3]] (!%p4674_p11) }
 0x33b   : > { %3868 = vmatprep.mubr.bf16.mxu1 %v3382_v22  ;;  %4755 = vmatpush3.bf16.msra.mxu1 %v5493_v24  ;;  %v5498_v29 = vld [vmem:[%s6206_s19 + $0x58] sm:$0xff]   ;;  %v5500_v32 = vld [vmem:[%s6206_s19 + $0x60] sm:$0xff]   ;;  %v5502_v34 = vld [vmem:[%s6206_s19 + $0x68] sm:$0xff]   ;;  %vm4025_vm2 = vcmask (!%p4674_p11), 7168  }
 0x33c   : > { %4756 = vmatprep.subr.bf16.mxu1 %v5494_v25  ;;  %v5499_v18 = vld [vmem:[%s6206_s19 + $0x18] sm:$0xff]   ;;  %v5501_v33 = vld [vmem:[%s6206_s19 + $0x20] sm:$0xff]   ;;  %v5503_v36 = vld [vmem:[%s6206_s19 + $0x28] sm:$0xff]  }
 0x33d   : > { %v5504_v40 = vld [vmem:[%s6206_s19 + $0x70] sm:$0xff]   ;;  %v5506_v8 = vld [vmem:[%s6206_s19 + $0x78] sm:$0xff]   ;;  %v5508_v37 = vld [vmem:[%s6206_s19 + $0xc0] sm:$0xff]  }
 0x33e   : > { %v5505_v15 = vld [vmem:[%s6206_s19 + $0x30] sm:$0xff]   ;;  %v5507_v19 = vld [vmem:[%s6206_s19 + $0x38] sm:$0xff]   ;;  %v5509_v39 = vld [vmem:[%s6206_s19 + $0x80] sm:$0xff]  }
 0x33f   : > { %4757 = vmatpush3.bf16.msra.mxu1 %v5495_v26  ;;  %v5510_v35 = vld [vmem:[%s6206_s19 + $0xc8] sm:$0xff]   ;;  %v5526_v42 = vld [vmem:[%s6206_s19 + $0x180] sm:$0xff]   ;;  %v5512_v44 = vld [vmem:[%s6206_s19 + $0xd0] sm:$0xff]  }
 0x340   : > { %4758 = vmatprep.subr.bf16.mxu1 %v5496_v28  ;;  %v5511_v43 = vld [vmem:[%s6206_s19 + $0x88] sm:$0xff]   ;;  %4836 = vmatpush3.bf16.msra.mxu0 %v5526_v42  ;;  %v5513_v45 = vld [vmem:[%s6206_s19 + $0x90] sm:$0xff]   ;;  %v5514_v31 = vld [vmem:[%s6206_s19 + $0xd8] sm:$0xff]  }
 0x341   : > { %4837 = vmatprep.subr.bf16.mxu0 %v5850_v27  ;;  %v5529_v11 = vld [vmem:[%s6206_s19 + $0x188] sm:$0xff]   ;;  %v5532_v46 = vld [vmem:[%s6206_s19 + $0x190] sm:$0xff]   ;;  %v5515_v47 = vld [vmem:[%s6206_s19 + $0x98] sm:$0xff]  }
 0x342   : > { %v5516_v0 = vld [vmem:[%s6206_s19 + $0xe0] sm:$0xff]   ;;  %v5535_v50 = vld [vmem:[%s6206_s19 + $0x198] sm:$0xff]   ;;  %v5518_v53 = vld [vmem:[%s6206_s19 + $0xe8] sm:$0xff]  }
 0x343   : > { %4759 = vmatpush3.bf16.msra.mxu1 %v5497_v49  ;;  %v5517_v51 = vld [vmem:[%s6206_s19 + $0xa0] sm:$0xff]   ;;  %v5519_v55 = vld [vmem:[%s6206_s19 + $0xa8] sm:$0xff]   ;;  %v5520_v56 = vld [vmem:[%s6206_s19 + $0xf0] sm:$0xff]  }
 0x344   : > { %4760 = vmatprep.subr.bf16.mxu1 %v5498_v29  ;;  %4838 = vmatpush3.bf16.msra.mxu0 %v5529_v11  ;;  %v5538_v54 = vld [vmem:[%s6206_s19 + $0x1a0] sm:$0xff]   ;;  %v5541_v57 = vld [vmem:[%s6206_s19 + $0x1a8] sm:$0xff]   ;;  %v5521_v58 = vld [vmem:[%s6206_s19 + $0xb0] sm:$0xff]  }
 0x345   : > { %4839 = vmatprep.subr.bf16.mxu0 %v5850_v27  ;;  %v5522_v59 = vld [vmem:[%s6206_s19 + $0xf8] sm:$0xff]   ;;  %v5544_v60 = vld [vmem:[%s6206_s19 + $0x1b0] sm:$0xff]   ;;  %v5524_v62 = vld [vmem:[%s6206_s19 + $0x140] sm:$0xff]  }
 0x346   : > { %v5523_v61 = vld [vmem:[%s6206_s19 + $0xb8] sm:$0xff]   ;;  %v5525_v2 = vld [vmem:[%s6206_s19 + $0x100] sm:$0xff]   ;;  %v5527_v4 = vld [vmem:[%s6206_s19 + $0x148] sm:$0xff]  }
 0x347   : > { %4761 = vmatpush3.bf16.msra.mxu1 %v5499_v18  ;;  %v5547_v63 = vld [vmem:[%s6206_s19 + $0x1b8] sm:$0xff]   ;;  %v5530_v30 = vld [vmem:[%s6206_s19 + $0x150] sm:$0xff]   ;;  %v5536_v52 = vld [vmem:[%s6206_s19 + $0x160] sm:$0xff]  }
 0x348   : > { %4762 = vmatprep.subr.bf16.mxu1 %v5500_v32  ;;  %4840 = vmatpush3.bf16.msra.mxu0 %v5532_v46  ;;  %v5531_v6 = vld [vmem:[%s6206_s19 + $0x110] sm:$0xff]   ;;  %v5533_v7 = vld [vmem:[%s6206_s19 + $0x158] sm:$0xff]   ;;  %v5537_v23 = vld [vmem:[%s6206_s19 + $0x120] sm:$0xff]  }
 0x349   : > { %4841 = vmatprep.subr.bf16.mxu0 %v5850_v27  ;;  %v5534_v9 = vld [vmem:[%s6206_s19 + $0x118] sm:$0xff]   ;;  %v5539_v10 = vld [vmem:[%s6206_s19 + $0x168] sm:$0xff]   ;;  %v5542_v12 = vld [vmem:[%s6206_s19 + $0x170] sm:$0xff]  }
 0x34a   : > { %v5540_v48 = vld [vmem:[%s6206_s19 + $0x128] sm:$0xff]   ;;  %v5543_v13 = vld [vmem:[%s6206_s19 + $0x130] sm:$0xff]   ;;  %v5545_v14 = vld [vmem:[%s6206_s19 + $0x178] sm:$0xff]  }
 0x34b   : > { %4763 = vmatpush3.bf16.msra.mxu1 %v5501_v33  ;;  %v5546_v17 = vld [vmem:[%s6206_s19 + $0x138] sm:$0xff]  }
 0x34c   : > { %4764 = vmatprep.subr.bf16.mxu1 %v5502_v34  ;;  %4842 = vmatpush3.bf16.msra.mxu0 %v5535_v50 }
 0x34d   : > { %4843 = vmatprep.subr.bf16.mxu0 %v5850_v27 }
 0x34f   : > { %4765 = vmatpush3.bf16.msra.mxu1 %v5503_v36 }
 0x350   : > { %4766 = vmatprep.subr.bf16.mxu1 %v5504_v40  ;;  %4844 = vmatpush3.bf16.msra.mxu0 %v5538_v54 }
 0x351   : > { %4845 = vmatprep.subr.bf16.mxu0 %v5850_v27 }
 0x353   : > { %4767 = vmatpush3.bf16.msra.mxu1 %v5505_v15 }
 0x354   : > { %4768 = vmatprep.subr.bf16.mxu1 %v5506_v8  ;;  %4846 = vmatpush3.bf16.msra.mxu0 %v5541_v57 }
 0x355   : > { %4847 = vmatprep.subr.bf16.mxu0 %v5850_v27 }
 0x357   : > { %4769 = vmatpush3.bf16.msra.mxu1 %v5507_v19 }
 0x358   : > { %4776 = vmatprep.subr.bf16.mxu1 %v5508_v37  ;;  %4848 = vmatpush3.bf16.msra.mxu0 %v5544_v60 }
 0x359   : > { %4849 = vmatprep.subr.bf16.mxu0 %v5850_v27  ;;  %v5528_v27 = vld [vmem:[%s6206_s19 + $0x108] sm:$0xff]  }
 0x35a   : > { %3869 = vmatmul.mubr.bf16.vlgmr.msra.gmra.mrb[28].mxu1 %v3381_v38 }
 0x35b   : > { %4777 = vmatpush3.bf16.msra.mxu1 %v5509_v39  ;;  %3908 = vmatprep.mubr.bf16.mxu1 %v3384_v41  ;;  %v3380_v41 = vld [vmem:[#allocation2] sm:$0xff] }
 0x35c   : > { %4778 = vmatprep.subr.bf16.mxu1 %v5510_v35  ;;  %4850 = vmatpush3.bf16.msra.mxu0 %v5547_v63 }
 0x35f   : > { %4779 = vmatpush3.bf16.msra.mxu1 %v5511_v43  ;;  %4852 = vmatmul.mubr.bf16.vlgmr.msra.gmra.mrb[8].mxu0 %v3387_v5 }
 0x360   : > { %4780 = vmatprep.subr.bf16.mxu1 %v5512_v44  ;;  %v4675_v44 = vld [vmem:[#allocation12] ss:$0 sm:$0xff] (!%p4674_p11) }
 0x363   : > { %4781 = vmatpush3.bf16.msra.mxu1 %v5513_v45  ;;  %v4676_v45 = vld [vmem:[#allocation13] ss:$0 sm:$0xff] (!%p4674_p11) }
 0x364   : > { %4782 = vmatprep.subr.bf16.mxu1 %v5514_v31 }
 0x367   : > { %4783 = vmatpush3.bf16.msra.mxu1 %v5515_v47  ;;  %v4023_v47 = vstv (!%p4674_p11), %s4022_s17 }
 0x368   : > { %4784 = vmatprep.subr.bf16.mxu1 %v5516_v0 }
 0x36b   : > { %4785 = vmatpush3.bf16.msra.mxu1 %v5517_v51 }
 0x36c   : > { %4786 = vmatprep.subr.bf16.mxu1 %v5518_v53 }
 0x36f   : > { %4787 = vmatpush3.bf16.msra.mxu1 %v5519_v55 }
 0x370   : > { %4788 = vmatprep.subr.bf16.mxu1 %v5520_v56 }
 0x373   : > { %4789 = vmatpush3.bf16.msra.mxu1 %v5521_v58 }
 0x374   : > { %4790 = vmatprep.subr.bf16.mxu1 %v5522_v59 }
 0x377   : > { %4791 = vmatpush3.bf16.msra.mxu1 %v5523_v61 }
 0x378   : > { %4798 = vmatprep.subr.bf16.mxu1 %v5524_v62 }
 0x37a   : > { %3909 = vmatmul.mubr.bf16.vlgmr.msra.gmra.mrb[32].mxu1 %v3383_v1 }
 0x37b   : > { %4799 = vmatpush3.bf16.msra.mxu1 %v5525_v2  ;;  %3948 = vmatprep.mubr.bf16.mxu1 %v3386_v3 }
 0x37c   : > { %4800 = vmatprep.subr.bf16.mxu1 %v5527_v4 }
 0x37f   : > { %4801 = vmatpush3.bf16.msra.mxu1 %v5528_v27 }
 0x380   : > { %4802 = vmatprep.subr.bf16.mxu1 %v5530_v30 }
 0x383   : > { %4803 = vmatpush3.bf16.msra.mxu1 %v5531_v6 }
 0x384   : > { %4804 = vmatprep.subr.bf16.mxu1 %v5533_v7 }
 0x387   : > { %4805 = vmatpush3.bf16.msra.mxu1 %v5534_v9 }
 0x388   : > { %4806 = vmatprep.subr.bf16.mxu1 %v5536_v52 }
 0x38b   : > { %4807 = vmatpush3.bf16.msra.mxu1 %v5537_v23 }
 0x38c   : > { %4808 = vmatprep.subr.bf16.mxu1 %v5539_v10 }
 0x38f   : > { %4809 = vmatpush3.bf16.msra.mxu1 %v5540_v48 }
 0x390   : > { %4810 = vmatprep.subr.bf16.mxu1 %v5542_v12 }
 0x393   : > { %4811 = vmatpush3.bf16.msra.mxu1 %v5543_v13 }
 0x394   : > { %4812 = vmatprep.subr.bf16.mxu1 %v5545_v14 }
 0x397   : > { %4813 = vmatpush3.bf16.msra.mxu1 %v5546_v17 }
 0x39a   : > { %3949 = vmatmul.mubr.bf16.vlgmr.msra.gmra.mrb[36].mxu1 %v3385_v20 }
 0x42d   : > { %v4770_v21 = vpop.f32.mrb[28].mxu1 }
 0x42e   : > { %v4771_v22 = vpop.f32.mrb[29].mxu1 }
 0x42f   : > { %v4772_v24 = vadd.f32 %v4771_v22, %v4770_v21  ;;  %v4773_v25 = vpop.f32.mrb[30].mxu1 }
 0x430   : > { %v4774_v26 = vpop.f32.mrb[31].mxu1 }
 0x432   : > { %v3990_v32 = vpop.f32.mrb[8].mxu0 }
 0x433   : > { %v4853_v34 = vpop.f32.mrb[9].mxu0 }
 0x434   : > { %v3993_v40 = vpop.f32.mrb[10].mxu0 }
 0x435   : > { %v4854_v15 = vpop.f32.mrb[11].mxu0 }
 0x44d   : > { %v4792_v28 = vpop.f32.mrb[32].mxu1 }
 0x44e   : > { %v4793_v49 = vpop.f32.mrb[33].mxu1 }
 0x44f   : > { %v4794_v29 = vadd.f32 %v4793_v49, %v4792_v28  ;;  %v4795_v18 = vpop.f32.mrb[34].mxu1 }
 0x450   : > { %v4796_v33 = vpop.f32.mrb[35].mxu1 }
 0x451   : > { %v3911_v36 = vadd.f32 %v4794_v29, %v4772_v24 }
 0x46d   : > { %v4814_v8 = vpop.f32.mrb[36].mxu1 }
 0x46e   : > { %v4815_v19 = vpop.f32.mrb[37].mxu1 }
 0x46f   : > { %v4816_v16 = vadd.f32 %v4815_v19, %v4814_v8  ;;  %v4817_v37 = vpop.f32.mrb[38].mxu1 }
 0x470   : > { %v4818_v38 = vpop.f32.mrb[39].mxu1 }
 0x471   : > { %v3951_v39 = vadd.f32 %v4816_v16, %v3911_v36  ;;  %4001 = sbr.rel (%p4674_p11) target bundleno = 1302 (0x516), region = 80 }
 0x473   : > { %v3991_v35 = vadd.f32 %v3990_v32, %v3951_v39 }
 0x475   : > { %v3996_v42 = vadd.f32 %v3991_v35, %v3380_v41 }
 0x477   : > { %3997 = vst [vmem:[#allocation2] sm:$0xff] %v3996_v42 }
 0x47e   : > { %v4002_v43 = vld [vmem:[#allocation2] sm:$0xff] }
 0x47f   : > { %v4010_v11 = vadd.f32 %v4675_v44, %v4002_v43 }
 0x481   : > { %v4011_v31 = vmax.f32 %v4010_v11, 0.0 }
 0x483   : > { %v4019_v46 = vmul.f32 %v4676_v45, %v4011_v31 }
 0x485   : > { %4020 = vadd.xlane.f32.xlu0 %v4019_v46 }
 0x512   : > { %v4021_v0 = vpop.xlane.xlu0 %4020 }
 0x513   : > { %v4024_v50 = vadd.f32 %v4023_v47, %v4021_v0 }
 0x515   : > { %4026 = vst.msk [vmem:[%s6843_s7] sm:$0xff] %vm4025_vm2, %v4024_v50 }
 0x516 PF: > { %s4684_s27 = smul.u32 896, %s5929_s6  ;;  %s4050_s21 = sshll.u32 %s6644_s15, 4  ;;  %s4051_s21 = int_to_ptr.vmem [resolvable:$true] %s4050_s21 }
 0x517   : > { %s6902_s10 = sld [smem:[#allocation32_spill]]  ;;  %s4028_s8 = scalar_lea.sflag [#allocation6], %s6190_s22 }
 0x518   : > { %s5722_s20 = scalar_lea.vmem %s4051_s21, 896  ;;  %p6903_p9 = scmp.ne.s32.totalorder %s6882_s30, 0 }
 0x519   : > { %p5723_p0 = scmp.ne.s32.totalorder %s4051_s21, %s5722_s20  ;;  %s5853_s13 = smov [#allocation15]  }
 0x51a   : > { %s5726_s25 = sshll.u32 %s5853_s13, 4  ;;  %s5727_s25 = int_to_ptr.vmem [resolvable:$false] %s5726_s25 }
 0x51b   : > { %p5724_p13 = pnand %p5723_p0, %p6903_p9  ;;  %s5728_s24 = scalar_lea.vmem %s5727_s25, 1792 }
 0x51c   : > { %p5729_p7 = scmp.lt.s32.totalorder %s4051_s21, %s5727_s25  ;;  %p5730_p12 = scmp.lt.s32.totalorder %s5728_s24, %s5722_s20 }
 0x51d   : > { %s6773_s11 = scalar_lea.hbm %s6902_s10, %s4684_s27  ;;  %p5725_p5 = pneg %p5724_p13 }
 0x51e   : > { %p5731_p10 = por %p5730_p12, %p5729_p7 }
 0x520   : > { %p5732_p6 = pnand %p5731_p10, %p5725_p5 }
 0x522   : > { %5735 = shalt.err (!%p5732_p6)
}
 0x523   : > { %s5736_s18 = scalar_lea.hbm %s6773_s11, 896  ;;  %s5740_s28 = scalar_lea.hbm %s6902_s10, 7168 }
 0x524   : > { %p5737_p2 = scmp.ne.s32.totalorder %s6773_s11, %s5736_s18  ;;  %p5741_p3 = scmp.lt.u32.totalorder %s6773_s11, %s6902_s10 }
 0x525   : > { %p5742_p1 = scmp.lt.u32.totalorder %s5740_s28, %s5736_s18  ;;  %p5744_p0 = scmp.lt.u32.totalorder %s5736_s18, %s6773_s11 }
 0x526   : > { %p5738_p4 = pnand %p5737_p2, %p6903_p9 }
 0x527   : > { %p5743_p11 = por %p5742_p1, %p5741_p3 }
 0x528   : > { %p5739_p8 = pneg %p5738_p4 }
 0x529   : > { %p5745_p13 = por %p5744_p0, %p5743_p11 }
 0x52b   : > { %p5746_p5 = pnand %p5745_p13, %p5739_p8 }
 0x52d   : > { %5749 = shalt.err (!%p5746_p5)
}
 0x52e   : > { %4911 = dma.vmem_to_hbm [thread:$0]  (%p6903_p9), %s4051_s21, 896, %s6773_s11, %s4028_s8  }
 0x52f   : > { %s6904_s29 = sld [smem:[#allocation33_spill]]  ;;  %s4064_s9 = sshll.u32 %s6635_s16, 4  ;;  %s4065_s9 = int_to_ptr.vmem [resolvable:$true] %s4064_s9 }
 0x530   : > { %s4033_s20 = scalar_lea.sflag [#allocation17], %s6190_s22  ;;  %s5750_s13 = scalar_lea.vmem %s4065_s9, 896 }
 0x531   : > { %p5751_p7 = scmp.ne.s32.totalorder %s4065_s9, %s5750_s13  ;;  %s5854_s25 = smov [#allocation16]  }
 0x532   : > { %s5754_s24 = sshll.u32 %s5854_s25, 4  ;;  %s5755_s24 = int_to_ptr.vmem [resolvable:$false] %s5754_s24 }
 0x533   : > { %p5752_p12 = pnand %p5751_p7, %p6903_p9  ;;  %s5756_s18 = scalar_lea.vmem %s5755_s24, 1792 }
 0x534   : > { %p5757_p6 = scmp.lt.s32.totalorder %s4065_s9, %s5755_s24  ;;  %p5758_p2 = scmp.lt.s32.totalorder %s5756_s18, %s5750_s13 }
 0x535   : > { %s6798_s26 = scalar_lea.hbm %s6904_s29, %s4684_s27  ;;  %p5753_p10 = pneg %p5752_p12 }
 0x536   : > { %p5759_p4 = por %p5758_p2, %p5757_p6 }
 0x538   : > { %p5760_p8 = pnand %p5759_p4, %p5753_p10 }
 0x53a   : > { %5763 = shalt.err (!%p5760_p8)
}
 0x53b   : > { %s5764_s6 = scalar_lea.hbm %s6798_s26, 896  ;;  %s5768_s27 = scalar_lea.hbm %s6904_s29, 7168 }
 0x53c   : > { %p5765_p3 = scmp.ne.s32.totalorder %s6798_s26, %s5764_s6  ;;  %p5769_p0 = scmp.lt.u32.totalorder %s6798_s26, %s6904_s29 }
 0x53d   : > { %p5770_p13 = scmp.lt.u32.totalorder %s5768_s27, %s5764_s6  ;;  %p5772_p7 = scmp.lt.u32.totalorder %s5764_s6, %s6798_s26 }
 0x53e   : > { %p5766_p1 = pnand %p5765_p3, %p6903_p9 }
 0x53f   : > { %p5771_p5 = por %p5770_p13, %p5769_p0 }
 0x540   : > { %p5767_p11 = pneg %p5766_p1 }
 0x541   : > { %p5773_p12 = por %p5772_p7, %p5771_p5 }
 0x543   : > { %p5774_p10 = pnand %p5773_p12, %p5767_p11 }
 0x545   : > { %5777 = shalt.err (!%p5774_p10)
}
 0x546   : > { %4912 = dma.vmem_to_hbm [thread:$0]  (%p6903_p9), %s4065_s9, 896, %s6798_s26, %s4033_s20  }
 0x547 PF: > { %s6905_s8 = sld [smem:[#allocation25_spill]]  ;;  %s6906_s4 = sld [smem:[#allocation27_spill]] }
 0x548   : > { %p4949_p6 = scmp.ge.s32.totalorder %s5836_s14, 2 }
 0x54d   : > { %s4079_s1 = sand.u32 1, %s6905_s8   ;;  %p6907_p2 = scmp.ne.s32.totalorder %s6906_s4, 0 }
 0x54e   : > { %s4080_s28 = scalar_lea.sflag [#allocation6], %s4079_s1 }
 0x54f   : > { %p4936_p4 = pnand %p4949_p6, %p6907_p2 }
 0x551   : > { %5815 = dma.done.wait (!%p4936_p4), %s4080_s28, 896  }
 0x552   : > { %5817 = vsyncadd (!%p4936_p4), %s4080_s28, 4294966400  ;;  %s4089_s19 = scalar_lea.sflag [#allocation17], %s4079_s1 }
 0x553   : > { %5819 = dma.done.wait (!%p4936_p4), %s4089_s19, 896  }
 0x554   : > { %5821 = vsyncadd (!%p4936_p4), %s4089_s19, 4294966400  ;;  %s6908_s14 = sld [smem:[#allocation28_spill]]  ;;  %s6909_s15 = sld [smem:[#allocation26_spill]] }
 0x555   : > { %s6910_s13 = sld [smem:[#allocation29_spill]]  ;;  %s6911_s11 = smov %s5828_s12 }
 0x55a   : > { %p32_p9 = scmp.ge.s32.totalorder %s6908_s14, 10   ;;  %s6912_s12 = smov %s6909_s15 }
 0x55c   :  { %34 = sbr.rel (!%p32_p9) target bundleno = 17 (0x11), region = 163 }
 0x563   :  { %4094 = vsyncpa [#allocation5], 1 }
 0x564   :  { %4096 = vsyncpa [#allocation5 + $0x1], 1 }
 0x565   :  { %4097 = vsyncpa [#allocation8], 1 }
 0x566   :  { %4099 = vsyncpa [#allocation8 + $0x1], 1 }
 0x567   :  { %4100 = vsyncpa [#allocation11], 1 }
 0x568   :  { %4102 = vsyncpa [#allocation11 + $0x1], 1 }
 0x569   :  { %4103 = vsyncpa [#allocation14], 1 }
 0x56a   :  { %4104 = vsyncpa [#allocation6], 1 }
 0x56b   :  { %4106 = vsyncpa [#allocation6 + $0x1], 1 }
 0x56c   :  { %4107 = vsyncpa [#allocation17], 1 }
 0x56d   :  { %4109 = vsyncpa [#allocation17 + $0x1], 1 }

</bundles_post_ra>
